<compile_context>
chip_gen: v7x
topology: tpu7x:2x2x1
jax: 0.10.0
libtpu: 0.0.40
codegen_flags: <defaults>
</compile_context>

<pallas_src>
from functools import partial

import jax
import jax.numpy as jnp
from jax.experimental import pallas as pl
from jax.experimental.pallas import tpu as pltpu

BN_EPS = 1e-5
LANE = 128
VMEM_LIMIT = 32 * 1024 * 1024  # explicit budget; load-bearing on v5e, safe on v6e/v7x


def _round_up(v, m):
    return (v + m - 1) // m * m


# --------------------------------------------------------------------------
# Kernel 1: acc = A @ X  (A already contains the (1+eps) diagonal), then
#           h1 = acc @ W1 + b1 (bf16 out) and per-row-tile BN1 partial stats.
#           grid = (row tiles [parallel], K tiles [arbitrary])
# --------------------------------------------------------------------------
def agg_lin1_kernel(adj_ref, xs_ref, w1_ref, b1_ref, h_ref, st_ref, acc_ref,
                    *, n_valid, tm):
    i = pl.program_id(0)
    k = pl.program_id(1)

    @pl.when(k == 0)
    def _():
        acc_ref[...] = jnp.zeros_like(acc_ref)

    # weighted-add aggregation (MXU, bf16 in / f32 accumulate)
    acc_ref[...] += jnp.dot(adj_ref[...], xs_ref[...],
                            preferred_element_type=jnp.float32)

    @pl.when(k == pl.num_programs(1) - 1)
    def _():
        # Linear1 fused into the finalize step
        h = jnp.dot(acc_ref[...].astype(jnp.bfloat16), w1_ref[...],
                    preferred_element_type=jnp.float32) + b1_ref[...]
        h_ref[...] = h.astype(h_ref.dtype)
        # per-tile BN1 partial statistics (mask padded rows)
        rows = i * tm + jax.lax.broadcasted_iota(jnp.int32, h.shape, 0)
        hm = jnp.where(rows < n_valid, h, 0.0)
        st_ref[0:1, :] = jnp.sum(hm, axis=0, keepdims=True)
        st_ref[1:2, :] = jnp.sum(hm * hm, axis=0, keepdims=True)


# --------------------------------------------------------------------------
# Kernel 2: BN1 apply (precomputed scale/shift) + Linear2 (bf16 out) + BN2
#           partial stats.  grid = (row tiles [parallel])
# --------------------------------------------------------------------------
def bn1_lin2_kernel(h_ref, sc_ref, sh_ref, w2_ref, b2_ref, o_ref, st_ref,
                    *, n_valid, tm):
    i = pl.program_id(0)
    z = h_ref[...].astype(jnp.float32) * sc_ref[...] + sh_ref[...]
    h2 = jnp.dot(z.astype(jnp.bfloat16), w2_ref[...],
                 preferred_element_type=jnp.float32) + b2_ref[...]
    o_ref[...] = h2.astype(o_ref.dtype)
    rows = i * tm + jax.lax.broadcasted_iota(jnp.int32, h2.shape, 0)
    hm = jnp.where(rows < n_valid, h2, 0.0)
    st_ref[0:1, :] = jnp.sum(hm, axis=0, keepdims=True)
    st_ref[1:2, :] = jnp.sum(hm * hm, axis=0, keepdims=True)


# --------------------------------------------------------------------------
# Kernel 3: final BN2 apply (precomputed scale/shift).  grid = (row tiles)
# --------------------------------------------------------------------------
def bn2_kernel(h_ref, sc_ref, sh_ref, o_ref):
    o_ref[...] = (h_ref[...].astype(jnp.float32) * sc_ref[...]
                  + sh_ref[...]).astype(o_ref.dtype)


# --------------------------------------------------------------------------
# Wrapper
# --------------------------------------------------------------------------
def _bn_affine(partials, gamma, beta, n):
    """Reduce per-tile (sum, sumsq) partials -> (scale, shift), each (1, C)."""
    s = jnp.sum(partials[:, 0, :], axis=0, keepdims=True)
    sq = jnp.sum(partials[:, 1, :], axis=0, keepdims=True)
    mu = s / n
    var = jnp.maximum(sq / n - mu * mu, 0.0)  # single-pass E[x^2]-E[x]^2, clamped
    scale = gamma * jax.lax.rsqrt(var + BN_EPS)
    shift = beta - mu * scale
    return scale, shift


def gin_conv(x, edge_index, edge_weight, params, eps=0.0, tm=512, tk=1024):
    """x: [N, C_in] f32, edge_index: [2, E] int32 (row 0 = src j, row 1 = dst i),
    edge_weight: [E] f32 or None."""
    N, c_in = x.shape
    c_out = params["w2"].shape[1]

    src, dst = edge_index[0], edge_index[1]
    if edge_weight is None:
        edge_weight = jnp.ones((edge_index.shape[1],), jnp.float32)

    # tile clamping for small graphs: tm,tk multiples of 128, tk multiple of tm,
    # n_pad multiple of tk (hence of tm).
    tm = _round_up(max(128, min(tm, _round_up(N, 128))), 128)
    tk = _round_up(max(tm, min(tk, _round_up(N, tm))), tm)
    n_pad = _round_up(N, tk)
    n_row_tiles = n_pad // tm
    ci_pad = _round_up(c_in, LANE)
    co_pad = _round_up(c_out, LANE)

    # glue: dense weighted adjacency built directly in bf16 (scatter-add matches
    # PyG duplicate-edge semantics).  The (1+eps) self-connection is folded into
    # the diagonal (padded rows' diagonal multiplies zero features, harmless).
    diag = jnp.arange(n_pad, dtype=jnp.int32)
    adj = (jnp.zeros((n_pad, n_pad), jnp.bfloat16)
           .at[dst, src].add(edge_weight.astype(jnp.bfloat16))
           .at[diag, diag].add(jnp.asarray(1.0 + float(eps), jnp.bfloat16)))

    # lane-padded node features (bf16 MXU stream)
    xs = jnp.zeros((n_pad, ci_pad), jnp.bfloat16).at[:N, :c_in].set(
        x.astype(jnp.bfloat16))

    def pad2(a, r, c):
        a = jnp.asarray(a, jnp.float32)
        return jnp.zeros((r, c), jnp.float32).at[:a.shape[0], :a.shape[1]].set(a)

    w1 = pad2(params["w1"], ci_pad, co_pad).astype(jnp.bfloat16)
    b1 = pad2(params["b1"], 1, co_pad)
    g1 = pad2(params["g1"], 1, co_pad)
    be1 = pad2(params["be1"], 1, co_pad)
    w2 = pad2(params["w2"], co_pad, co_pad).astype(jnp.bfloat16)
    b2 = pad2(params["b2"], 1, co_pad)
    g2 = pad2(params["g2"], 1, co_pad)
    be2 = pad2(params["be2"], 1, co_pad)

    # ---- pass 1: aggregation + Linear1 + BN1 partial stats ----
    h1, st1 = pl.pallas_call(
        partial(agg_lin1_kernel, n_valid=int(N), tm=tm),
        out_shape=(jax.ShapeDtypeStruct((n_pad, co_pad), jnp.bfloat16),
                   jax.ShapeDtypeStruct((n_row_tiles, 2, co_pad), jnp.float32)),
        grid_spec=pltpu.PrefetchScalarGridSpec(
            num_scalar_prefetch=0,
            grid=(n_row_tiles, n_pad // tk),
            in_specs=[
                pl.BlockSpec((tm, tk), lambda i, k: (i, k)),          # adj tile
                pl.BlockSpec((tk, ci_pad), lambda i, k: (k, 0)),      # x sources
                pl.BlockSpec((ci_pad, co_pad), lambda i, k: (0, 0)),  # W1 resident
                pl.BlockSpec((1, co_pad), lambda i, k: (0, 0)),       # b1 resident
            ],
            out_specs=[
                pl.BlockSpec((tm, co_pad), lambda i, k: (i, 0)),          # h1 (bf16)
                pl.BlockSpec((None, 2, co_pad), lambda i, k: (i, 0, 0)),  # stats
            ],
            scratch_shapes=[pltpu.VMEM((tm, ci_pad), jnp.float32)],
        ),
        compiler_params=pltpu.CompilerParams(
            dimension_semantics=("parallel", "arbitrary"),
            vmem_limit_bytes=VMEM_LIMIT),
    )(adj, xs, w1, b1)

    # ---- BN1 affine (tiny XLA reduction over per-tile partials) ----
    sc1, sh1 = _bn_affine(st1, g1, be1, float(N))

    # ---- pass 2: BN1 apply + Linear2 + BN2 partial stats ----
    h2, st2 = pl.pallas_call(
        partial(bn1_lin2_kernel, n_valid=int(N), tm=tm),
        out_shape=(jax.ShapeDtypeStruct((n_pad, co_pad), jnp.bfloat16),
                   jax.ShapeDtypeStruct((n_row_tiles, 2, co_pad), jnp.float32)),
        grid_spec=pltpu.PrefetchScalarGridSpec(
            num_scalar_prefetch=0,
            grid=(n_row_tiles,),
            in_specs=[
                pl.BlockSpec((tm, co_pad), lambda i: (i, 0)),          # h1 (bf16)
                pl.BlockSpec((1, co_pad), lambda i: (0, 0)),           # BN1 scale
                pl.BlockSpec((1, co_pad), lambda i: (0, 0)),           # BN1 shift
                pl.BlockSpec((co_pad, co_pad), lambda i: (0, 0)),      # W2 resident
                pl.BlockSpec((1, co_pad), lambda i: (0, 0)),           # b2 resident
            ],
            out_specs=[
                pl.BlockSpec((tm, co_pad), lambda i: (i, 0)),          # h2 (bf16)
                pl.BlockSpec((None, 2, co_pad), lambda i: (i, 0, 0)),  # stats
            ],
        ),
        compiler_params=pltpu.CompilerParams(
            dimension_semantics=("parallel",),
            vmem_limit_bytes=VMEM_LIMIT),
    )(h1, sc1, sh1, w2, b2)

    # ---- BN2 affine ----
    sc2, sh2 = _bn_affine(st2, g2, be2, float(N))

    # ---- pass 3: final BN2 apply ----
    out = pl.pallas_call(
        bn2_kernel,
        out_shape=jax.ShapeDtypeStruct((n_pad, co_pad), jnp.float32),
        grid_spec=pltpu.PrefetchScalarGridSpec(
            num_scalar_prefetch=0,
            grid=(n_row_tiles,),
            in_specs=[
                pl.BlockSpec((tm, co_pad), lambda i: (i, 0)),
                pl.BlockSpec((1, co_pad), lambda i: (0, 0)),
                pl.BlockSpec((1, co_pad), lambda i: (0, 0)),
            ],
            out_specs=pl.BlockSpec((tm, co_pad), lambda i: (i, 0)),
        ),
        compiler_params=pltpu.CompilerParams(
            dimension_semantics=("parallel",),
            vmem_limit_bytes=VMEM_LIMIT),
    )(h2, sc2, sh2)

    return out[:N, :c_out]


def init_params(key, c_in, c_out):
    ks = jax.random.split(key, 4)
    bound1 = 1.0 / (c_in ** 0.5)
    bound2 = 1.0 / (c_out ** 0.5)
    return {
        # Linear weights stored pre-transposed [C_in, C_out] so kernels do h @ W.
        "w1": jax.random.uniform(ks[0], (c_in, c_out), jnp.float32, -bound1, bound1),
        "b1": jax.random.uniform(ks[1], (1, c_out), jnp.float32, -bound1, bound1),
        "g1": jnp.ones((1, c_out), jnp.float32),
        "be1": jnp.zeros((1, c_out), jnp.float32),
        "w2": jax.random.uniform(ks[2], (c_out, c_out), jnp.float32, -bound2, bound2),
        "b2": jax.random.uniform(ks[3], (1, c_out), jnp.float32, -bound2, bound2),
        "g2": jnp.ones((1, c_out), jnp.float32),
        "be2": jnp.zeros((1, c_out), jnp.float32),
    }


def gin_conv_ref(x, edge_index, edge_weight, params, eps=0.0):
    """Pure-JAX f32 reference for the forward pass (training-mode BN stats)."""
    src, dst = edge_index[0], edge_index[1]
    if edge_weight is None:
        edge_weight = jnp.ones((edge_index.shape[1],), jnp.float32)
    agg = jnp.zeros_like(x).at[dst].add(edge_weight[:, None] * x[src])
    h = agg + (1.0 + eps) * x
    h = h @ params["w1"] + params["b1"]
    mu = h.mean(0, keepdims=True)
    var = ((h - mu) ** 2).mean(0, keepdims=True)
    h = (h - mu) * jax.lax.rsqrt(var + BN_EPS) * params["g1"] + params["be1"]
    h = h @ params["w2"] + params["b2"]
    mu = h.mean(0, keepdims=True)
    var = ((h - mu) ** 2).mean(0, keepdims=True)
    return (h - mu) * jax.lax.rsqrt(var + BN_EPS) * params["g2"] + params["be2"]


if __name__ == "__main__":
    N, E, C_IN, C_OUT = 512, 2048, 16, 32
    key = jax.random.PRNGKey(0)
    kx, ks, kd, kw, kp = jax.random.split(key, 5)

    x = jax.random.normal(kx, (N, C_IN), jnp.float32)
    src = jax.random.randint(ks, (E,), 0, N, dtype=jnp.int32)
    dst = jax.random.randint(kd, (E,), 0, N, dtype=jnp.int32)
    edge_index = jnp.stack([src, dst])
    edge_weight = jax.random.uniform(kw, (E,), jnp.float32)

    params = init_params(kp, C_IN, C_OUT)

    out = gin_conv(x, edge_index, edge_weight, params, eps=0.0)
    jax.block_until_ready(out)
    assert out.shape == (N, C_OUT) and out.dtype == jnp.float32
    assert bool(jnp.all(jnp.isfinite(out)))

    ref = gin_conv_ref(x, edge_index, edge_weight, params, eps=0.0)
    err = float(jnp.max(jnp.abs(out - ref)))
    # bf16 MXU inputs / bf16 intermediates vs an f32 reference -> loose tolerance.
    assert err < 0.2, f"max abs error vs f32 reference too large: {err}"
    print("KERNEL_OK")
</pallas_src>

<mosaic_0001>
module attributes {stable_mosaic.version = 11 : i64} {
  func.func @agg_lin1_kernel(%arg0: i32, %arg1: i32, %arg2: memref<512x512xbf16, #tpu.memory_space<vmem>>, %arg3: memref<512x128xbf16, #tpu.memory_space<vmem>>, %arg4: memref<128x128xbf16, #tpu.memory_space<vmem>>, %arg5: memref<1x128xf32, #tpu.memory_space<vmem>>, %arg6: memref<512x128xbf16, #tpu.memory_space<vmem>>, %arg7: memref<1x2x128xf32, #tpu.memory_space<vmem>>, %arg8: memref<512x128xf32, #tpu.memory_space<vmem>>) attributes {dimension_semantics = [#tpu.dimension_semantics<parallel>, #tpu.dimension_semantics<arbitrary>], iteration_bounds = array<i64: 1, 1>, scalar_prefetch = 0 : i64, scratch_operands = 1 : i64, tpu.core_type = #tpu.core_type<tc>, window_params = [{transform_indices = @transform_0, window_bounds = array<i64: 512, 512>}, {transform_indices = @transform_1, window_bounds = array<i64: 512, 128>}, {pipeline_mode = #tpu.pipeline_mode<synchronous>, transform_indices = @transform_2, window_bounds = array<i64: 128, 128>}, {pipeline_mode = #tpu.pipeline_mode<synchronous>, transform_indices = @transform_3, window_bounds = array<i64: 1, 128>}, {transform_indices = @transform_4, window_bounds = array<i64: 512, 128>}, {transform_indices = @transform_5, window_bounds = array<i64: 1, 2, 128>}]} {
    %c0_i32 = arith.constant 0 : i32
    %0 = arith.cmpi eq, %arg1, %c0_i32 : i32
    %1 = arith.extui %0 : i1 to i32
    %c0_i32_0 = arith.constant 0 : i32
    %2 = arith.cmpi ne, %1, %c0_i32_0 : i32
    scf.if %2 {
      %cst_10 = arith.constant 0.000000e+00 : f32
      %12 = vector.broadcast %cst_10 : f32 to vector<512x128xf32>
      %c0_11 = arith.constant 0 : index
      %c0_12 = arith.constant 0 : index
      %13 = vector.load %arg8[%c0_11, %c0_12] : memref<512x128xf32, #tpu.memory_space<vmem>>, vector<512x128xf32>
      tpu.vector_store %arg8[%c0_11, %c0_12], %12 {strides = array<i32>} : memref<512x128xf32, #tpu.memory_space<vmem>>, vector<512x128xf32>,
    } else {
    }
    %c0 = arith.constant 0 : index
    %c0_1 = arith.constant 0 : index
    %3 = vector.load %arg8[%c0, %c0_1] : memref<512x128xf32, #tpu.memory_space<vmem>>, vector<512x128xf32>
    %c0_2 = arith.constant 0 : index
    %c0_3 = arith.constant 0 : index
    %4 = vector.load %arg2[%c0_2, %c0_3] : memref<512x512xbf16, #tpu.memory_space<vmem>>, vector<512x512xbf16>
    %c0_4 = arith.constant 0 : index
    %c0_5 = arith.constant 0 : index
    %5 = vector.load %arg3[%c0_4, %c0_5] : memref<512x128xbf16, #tpu.memory_space<vmem>>, vector<512x128xbf16>
    %cst = arith.constant dense<0.000000e+00> : vector<512x128xf32>
    %6 = tpu.matmul %4, %5, %cst {dimension_numbers = #tpu.dot_dimension_numbers<[1], [0], [0], [1], [0, 0, 1, 1], [], []>} : vector<512x512xbf16>, vector<512x128xbf16>, vector<512x128xf32> -> vector<512x128xf32>
    %7 = arith.addf %3, %6 : vector<512x128xf32>
    %c0_6 = arith.constant 0 : index
    %c0_7 = arith.constant 0 : index
    %8 = vector.load %arg8[%c0_6, %c0_7] : memref<512x128xf32, #tpu.memory_space<vmem>>, vector<512x128xf32>
    tpu.vector_store %arg8[%c0_6, %c0_7], %7 {strides = array<i32>} : memref<512x128xf32, #tpu.memory_space<vmem>>, vector<512x128xf32>,
    %c0_i32_8 = arith.constant 0 : i32
    %9 = arith.cmpi eq, %arg1, %c0_i32_8 : i32
    %10 = arith.extui %9 : i1 to i32
    %c0_i32_9 = arith.constant 0 : i32
    %11 = arith.cmpi ne, %10, %c0_i32_9 : i32
    scf.if %11 {
      %c0_10 = arith.constant 0 : index
      %c0_11 = arith.constant 0 : index
      %12 = vector.load %arg8[%c0_10, %c0_11] : memref<512x128xf32, #tpu.memory_space<vmem>>, vector<512x128xf32>
      %13 = arith.truncf %12 : vector<512x128xf32> to vector<512x128xbf16>
      %c0_12 = arith.constant 0 : index
      %c0_13 = arith.constant 0 : index
      %14 = vector.load %arg4[%c0_12, %c0_13] : memref<128x128xbf16, #tpu.memory_space<vmem>>, vector<128x128xbf16>
      %cst_14 = arith.constant dense<0.000000e+00> : vector<512x128xf32>
      %15 = tpu.matmul %13, %14, %cst_14 {dimension_numbers = #tpu.dot_dimension_numbers<[1], [0], [0], [1], [0, 0, 1, 1], [], []>} : vector<512x128xbf16>, vector<128x128xbf16>, vector<512x128xf32> -> vector<512x128xf32>
      %c0_15 = arith.constant 0 : index
      %c0_16 = arith.constant 0 : index
      %16 = vector.load %arg5[%c0_15, %c0_16] : memref<1x128xf32, #tpu.memory_space<vmem>>, vector<1x128xf32>
      %17 = vector.broadcast %16 : vector<1x128xf32> to vector<512x128xf32>
      %18 = arith.addf %15, %17 : vector<512x128xf32>
      %19 = arith.truncf %18 : vector<512x128xf32> to vector<512x128xbf16>
      %c0_17 = arith.constant 0 : index
      %c0_18 = arith.constant 0 : index
      %20 = vector.load %arg6[%c0_17, %c0_18] : memref<512x128xbf16, #tpu.memory_space<vmem>>, vector<512x128xbf16>
      tpu.vector_store %arg6[%c0_17, %c0_18], %19 {strides = array<i32>} : memref<512x128xbf16, #tpu.memory_space<vmem>>, vector<512x128xbf16>,
      %c512_i32 = arith.constant 512 : i32
      %21 = arith.muli %arg0, %c512_i32 : i32
      %22 = tpu.iota {dimensions = array<i32: 0>} : vector<512x128xi32>
      %23 = vector.broadcast %21 : i32 to vector<512x128xi32>
      %24 = arith.addi %23, %22 : vector<512x128xi32>
      %c512_i32_19 = arith.constant 512 : i32
      %25 = vector.broadcast %c512_i32_19 : i32 to vector<512x128xi32>
      %26 = arith.cmpi slt, %24, %25 : vector<512x128xi32>
      %cst_20 = arith.constant 0.000000e+00 : f32
      %27 = vector.broadcast %cst_20 : f32 to vector<512x128xf32>
      %28 = arith.select %26, %18, %27 : vector<512x128xi1>, vector<512x128xf32>
      %cst_21 = arith.constant dense<0.000000e+00> : vector<128xf32>
      %29 = vector.multi_reduction <add>, %28, %cst_21 [0] : vector<512x128xf32> to vector<128xf32>
      %30 = vector.shape_cast %29 : vector<128xf32> to vector<1x128xf32>
      %c0_22 = arith.constant 0 : index
      %c0_23 = arith.constant 0 : index
      %c0_24 = arith.constant 0 : index
      %31 = vector.load %arg7[%c0_22, %c0_23, %c0_24] : memref<1x2x128xf32, #tpu.memory_space<vmem>>, vector<1x1x128xf32>
      %32 = vector.shape_cast %31 : vector<1x1x128xf32> to vector<1x128xf32>
      %33 = vector.shape_cast %30 : vector<1x128xf32> to vector<1x1x128xf32>
      tpu.vector_store %arg7[%c0_22, %c0_23, %c0_24], %33 {strides = array<i32>} : memref<1x2x128xf32, #tpu.memory_space<vmem>>, vector<1x1x128xf32>,
      %34 = arith.mulf %28, %28 : vector<512x128xf32>
      %cst_25 = arith.constant dense<0.000000e+00> : vector<128xf32>
      %35 = vector.multi_reduction <add>, %34, %cst_25 [0] : vector<512x128xf32> to vector<128xf32>
      %36 = vector.shape_cast %35 : vector<128xf32> to vector<1x128xf32>
      %c0_26 = arith.constant 0 : index
      %c1 = arith.constant 1 : index
      %c0_27 = arith.constant 0 : index
      %37 = vector.load %arg7[%c0_26, %c1, %c0_27] : memref<1x2x128xf32, #tpu.memory_space<vmem>>, vector<1x1x128xf32>
      %38 = vector.shape_cast %37 : vector<1x1x128xf32> to vector<1x128xf32>
      %39 = vector.shape_cast %36 : vector<1x128xf32> to vector<1x1x128xf32>
      tpu.vector_store %arg7[%c0_26, %c1, %c0_27], %39 {strides = array<i32>} : memref<1x2x128xf32, #tpu.memory_space<vmem>>, vector<1x1x128xf32>,
    } else {
    }
    return
  }
  func.func @transform_0(%arg0: i32, %arg1: i32) -> (i32, i32) {
    %c0_i32 = arith.constant 0 : i32
    return %arg0, %arg1 : i32, i32
  }
  func.func @transform_1(%arg0: i32, %arg1: i32) -> (i32, i32) {
    %c0_i32 = arith.constant 0 : i32
    %c0_i32_0 = arith.constant 0 : i32
    return %arg1, %c0_i32 : i32, i32
  }
  func.func @transform_2(%arg0: i32, %arg1: i32) -> (i32, i32) {
    %c0_i32 = arith.constant 0 : i32
    %c0_i32_0 = arith.constant 0 : i32
    %c0_i32_1 = arith.constant 0 : i32
    return %c0_i32, %c0_i32_0 : i32, i32
  }
  func.func @transform_3(%arg0: i32, %arg1: i32) -> (i32, i32) {
    %c0_i32 = arith.constant 0 : i32
    %c0_i32_0 = arith.constant 0 : i32
    %c0_i32_1 = arith.constant 0 : i32
    return %c0_i32, %c0_i32_0 : i32, i32
  }
  func.func @transform_4(%arg0: i32, %arg1: i32) -> (i32, i32) {
    %c0_i32 = arith.constant 0 : i32
    %c0_i32_0 = arith.constant 0 : i32
    return %arg0, %c0_i32 : i32, i32
  }
  func.func @transform_5(%arg0: i32, %arg1: i32) -> (i32, i32, i32) {
    %c0_i32 = arith.constant 0 : i32
    %c0_i32_0 = arith.constant 0 : i32
    %c0_i32_1 = arith.constant 0 : i32
    return %arg0, %c0_i32, %c0_i32_0 : i32, i32, i32
  }
}

</mosaic_0001>

<bundles_post_ra>
// kernel: tpu_custom_call.1
= control target key start
LH: loop header
LB: loop body
LE: loop exit
PB: predicated region body
PF: predicated region fallthrough
CT: control target
= control target key end

     0   :  { %11 = vsyncpa [#allocation4], 0  ;;  %s4649_s0 = inlined_call_operand.hbm [shape: bf16[512,512], index: 0, kind: input, shape index: {}]   ;;  %s4650_s1 = inlined_call_operand.hbm [shape: bf16[512,128], index: 1, kind: input, shape index: {}]   ;;  %s4651_s2 = inlined_call_operand.hbm [shape: bf16[128,128], index: 2, kind: input, shape index: {}]   ;;  %s4652_s3 = inlined_call_operand.vmem [shape: f32[1,128], index: 3, kind: input, shape index: {}]   ;;  %s4653_s4 = inlined_call_operand.hbm [shape: bf16[512,128], index: 4, kind: output, shape index: {0}]   ;;  %s4654_s5 = inlined_call_operand.hbm [shape: f32[1,2,128], index: 5, kind: output, shape index: {1}]  }
   0x1   :  { %12 = vsyncpa [#allocation7], 0 }
   0x2   :  { %13 = vsyncpa [#allocation5], 0 }
   0x3   :  { %14 = vsyncpa [#allocation11], 0  ;;  %s4279_s18 = smov [#allocation6]   ;;  %s4161_s22 = scalar_lea.hbm %s4650_s1, 4096 }
   0x4   :  { %s32_s19 = sshll.u32 %s4279_s18, 4  ;;  %p4162_p0 = scmp.ne.s32.totalorder %s4650_s1, %s4161_s22  ;;  %s33_s19 = int_to_ptr.vmem [resolvable:$true] %s32_s19 }
   0x5   :  { %p4165_p1 = scmp.lt.u32.totalorder %s4161_s22, %s4650_s1 }
   0x7   :  { %p4167_p2 = pnand %p4165_p1, %p4162_p0 }
   0x9   :  { %4170 = shalt.err (!%p4167_p2)
}
   0xa   :  { %s4171_s27 = scalar_lea.vmem %s33_s19, 4096  ;;  %p4176_p4 = scmp.lt.s32.totalorder %s33_s19, %s33_s19 }
   0xb   :  { %p4172_p3 = scmp.ne.s32.totalorder %s33_s19, %s4171_s27  ;;  %p4177_p5 = scmp.lt.s32.totalorder %s4171_s27, %s4171_s27 }
   0xd   :  { %p4178_p6 = por %p4177_p5, %p4176_p4 }
   0xf   :  { %p4179_p7 = pnand %p4178_p6, %p4172_p3 }
  0x11   :  { %4182 = shalt.err (!%p4179_p7)
}
  0x12   :  { %s4280_s28 = smov 64   ;;  %s4281_s29 = smov 4  }
  0x13   :  { %38 = dma.hbm_to_vmem [thread:$0]  %s4650_s1, 4096, %s33_s19, [#allocation7], %s4280_s28, %s4280_s28, %s4281_s29  }
  0x14   :  { %s4282_s7 = smov [#allocation3]   ;;  %s4183_s11 = scalar_lea.hbm %s4649_s0, 16384 }
  0x15   :  { %s20_s8 = sshll.u32 %s4282_s7, 4  ;;  %p4184_p8 = scmp.ne.s32.totalorder %s4649_s0, %s4183_s11  ;;  %s21_s8 = int_to_ptr.vmem [resolvable:$true] %s20_s8 }
  0x16   :  { %p4187_p9 = scmp.lt.u32.totalorder %s4183_s11, %s4649_s0 }
  0x18   :  { %p4189_p10 = pnand %p4187_p9, %p4184_p8 }
  0x1a   :  { %4192 = shalt.err (!%p4189_p10)
}
  0x1b   :  { %s4193_s16 = scalar_lea.vmem %s21_s8, 16384  ;;  %p4198_p12 = scmp.lt.s32.totalorder %s21_s8, %s21_s8 }
  0x1c   :  { %p4194_p11 = scmp.ne.s32.totalorder %s21_s8, %s4193_s16  ;;  %p4199_p13 = scmp.lt.s32.totalorder %s4193_s16, %s4193_s16 }
  0x1e   :  { %p4200_p0 = por %p4199_p13, %p4198_p12 }
  0x20   :  { %p4201_p1 = pnand %p4200_p0, %p4194_p11 }
  0x22   :  { %4204 = shalt.err (!%p4201_p1)
}
  0x23   :  { %s4283_s1 = smov 256   ;;  %s4284_s17 = smov 16  }
  0x24   :  { %26 = dma.hbm_to_vmem [thread:$0]  %s4649_s0, 16384, %s21_s8, [#allocation4], %s4283_s1, %s4283_s1, %s4284_s17  }
  0x25   :  { %s4285_s20 = smov [#allocation8]   ;;  %s4205_s24 = scalar_lea.hbm %s4651_s2, 1024 }
  0x26   :  { %s44_s21 = sshll.u32 %s4285_s20, 4  ;;  %p4206_p2 = scmp.ne.s32.totalorder %s4651_s2, %s4205_s24  ;;  %s45_s21 = int_to_ptr.vmem [resolvable:$true] %s44_s21 }
  0x27   :  { %p4209_p3 = scmp.lt.u32.totalorder %s4205_s24, %s4651_s2 }
  0x29   :  { %p4211_p4 = pnand %p4209_p3, %p4206_p2 }
  0x2b   :  { %4214 = shalt.err (!%p4211_p4)
}
  0x2c   :  { %s4215_s6 = scalar_lea.vmem %s45_s21, 1024  ;;  %p4220_p6 = scmp.lt.s32.totalorder %s45_s21, %s45_s21 }
  0x2d   :  { %p4216_p5 = scmp.ne.s32.totalorder %s45_s21, %s4215_s6  ;;  %p4221_p7 = scmp.lt.s32.totalorder %s4215_s6, %s4215_s6 }
  0x2f   :  { %p4222_p8 = por %p4221_p7, %p4220_p6 }
  0x31   :  { %p4223_p9 = pnand %p4222_p8, %p4216_p5 }
  0x33   :  { %4226 = shalt.err (!%p4223_p9)
}
  0x34   :  { %50 = dma.hbm_to_vmem [thread:$0]  %s4651_s2, 1024, %s45_s21, [#allocation7], %s4280_s28, %s4280_s28, %s4281_s29  }
  0x35   :  { %4271 = dma.done.wait [#allocation4], 16384  }
  0x36   :  { %4272 = vsyncadd [#allocation4], 4294950912 }
  0x37   :  { %4273 = dma.done.wait [#allocation7], 5120  }
  0x38   :  { %4274 = vsyncadd [#allocation7], 4294962176  ;;  %v4286_v0 = vmov 0   ;;  %v3929_v1 = vld [vmem:[#allocation6] sm:$0xff]   ;;  %v3930_v2 = vld [vmem:[#allocation6 + $0x8] sm:$0xff]  }
  0x39   :  { %1219 = vmatprep.subr.bf16.mxu0 %v4286_v0  ;;  %3807 = vmatprep.subr.bf16.mxu1 %v4286_v0  ;;  %v3931_v3 = vld [vmem:[#allocation6 + $0x10] sm:$0xff]   ;;  %v3932_v4 = vld [vmem:[#allocation6 + $0x18] sm:$0xff]   ;;  %v3933_v5 = vld [vmem:[#allocation6 + $0x20] sm:$0xff]  }
  0x3a   :  { %1220 = vmatpush1.bf16.msra.mxu0 %v3929_v1  ;;  %3823 = vmatpush1.bf16.msra.mxu1 %v3929_v1  ;;  %v3947_v6 = vld [vmem:[#allocation3 + $0x4] ss:$16 sps:$4 sm:$0xff]   ;;  %v3934_v7 = vld [vmem:[#allocation6 + $0x28] sm:$0xff]   ;;  %v3936_v9 = vld [vmem:[#allocation6 + $0x38] sm:$0xff]  }
  0x3b   :  { %1221 = vmatprep.subr.bf16.mxu0 %v4286_v0  ;;  %3808 = vmatprep.subr.bf16.mxu1 %v4286_v0  ;;  %v3935_v8 = vld [vmem:[#allocation6 + $0x30] sm:$0xff]   ;;  %v3937_v10 = vld [vmem:[#allocation6 + $0x40] sm:$0xff]   ;;  %v3938_v11 = vld [vmem:[#allocation6 + $0x48] sm:$0xff]  }
  0x3c   :  { %1251 = vmatprep.mubr.bf16.mxu0 %v3947_v6  ;;  %v3939_v12 = vld [vmem:[#allocation6 + $0x50] sm:$0xff]   ;;  %v3940_v13 = vld [vmem:[#allocation6 + $0x58] sm:$0xff]   ;;  %v3941_v14 = vld [vmem:[#allocation6 + $0x60] sm:$0xff]  }
  0x3d   :  { %v3999_v15 = vld [vmem:[#allocation3 + $0x104] ss:$16 sps:$4 sm:$0xff]   ;;  %v3942_v16 = vld [vmem:[#allocation6 + $0x68] sm:$0xff]   ;;  %v3944_v18 = vld [vmem:[#allocation6 + $0x78] sm:$0xff]  }
  0x3e   :  { %1222 = vmatpush1.bf16.msra.mxu0 %v3930_v2  ;;  %3824 = vmatpush1.bf16.msra.mxu1 %v3930_v2  ;;  %v3943_v17 = vld [vmem:[#allocation6 + $0x70] sm:$0xff]   ;;  %v3948_v20 = vld [vmem:[#allocation6 + $0x80] sm:$0xff]   ;;  %v3949_v24 = vld [vmem:[#allocation6 + $0x88] sm:$0xff]  }
  0x3f   :  { %1223 = vmatprep.subr.bf16.mxu0 %v4286_v0  ;;  %3809 = vmatprep.subr.bf16.mxu1 %v4286_v0  ;;  %v3945_v19 = vld [vmem:[#allocation3] ss:$16 sps:$4 sm:$0xff]   ;;  %v3950_v21 = vld [vmem:[#allocation3 + $0x24] ss:$16 sps:$4 sm:$0xff]   ;;  %v3954_v30 = vld [vmem:[#allocation6 + $0x98] sm:$0xff]  }
  0x40   :  { %1315 = vmatprep.mubr.bf16.mxu1 %v3999_v15  ;;  %v3997_v22 = vld [vmem:[#allocation3 + $0x100] ss:$16 sps:$4 sm:$0xff]   ;;  %v4003_v23 = vld [vmem:[#allocation3 + $0x124] ss:$16 sps:$4 sm:$0xff]   ;;  %v3959_v36 = vld [vmem:[#allocation6 + $0xa8] sm:$0xff]  }
  0x41   :  { %v3952_v25 = vld [vmem:[#allocation3 + $0x20] ss:$16 sps:$4 sm:$0xff]   ;;  %v3955_v28 = vld [vmem:[#allocation3 + $0x44] ss:$16 sps:$4 sm:$0xff]   ;;  %v3964_v42 = vld [vmem:[#allocation6 + $0xb8] sm:$0xff]  }
  0x42   :  { %1224 = vmatpush1.bf16.msra.mxu0 %v3931_v3  ;;  %3825 = vmatpush1.bf16.msra.mxu1 %v3931_v3  ;;  %v4005_v26 = vld [vmem:[#allocation3 + $0x120] ss:$16 sps:$4 sm:$0xff]   ;;  %v4009_v29 = vld [vmem:[#allocation3 + $0x144] ss:$16 sps:$4 sm:$0xff]   ;;  %v3969_v48 = vld [vmem:[#allocation6 + $0xc8] sm:$0xff]  }
  0x43   :  { %1225 = vmatprep.subr.bf16.mxu0 %v4286_v0  ;;  %3810 = vmatprep.subr.bf16.mxu1 %v4286_v0  ;;  %v3953_v27 = vld [vmem:[#allocation6 + $0x90] sm:$0xff]   ;;  %v3958_v33 = vld [vmem:[#allocation6 + $0xa0] sm:$0xff]   ;;  %v3974_v54 = vld [vmem:[#allocation6 + $0xd8] sm:$0xff]  }
  0x44   :  { %v3957_v31 = vld [vmem:[#allocation3 + $0x40] ss:$16 sps:$4 sm:$0xff]   ;;  %v3960_v34 = vld [vmem:[#allocation3 + $0x64] ss:$16 sps:$4 sm:$0xff]   ;;  %v3979_v60 = vld [vmem:[#allocation6 + $0xe8] sm:$0xff]  }
  0x45   :  { %v4011_v32 = vld [vmem:[#allocation3 + $0x140] ss:$16 sps:$4 sm:$0xff]   ;;  %v4015_v35 = vld [vmem:[#allocation3 + $0x164] ss:$16 sps:$4 sm:$0xff]   ;;  %v3987_v1 = vld [vmem:[#allocation3 + $0xc] ss:$16 sps:$4 sm:$0xff]  }
  0x46   :  { %1226 = vmatpush1.bf16.msra.mxu0 %v3932_v4  ;;  %3826 = vmatpush1.bf16.msra.mxu1 %v3932_v4  ;;  %v3962_v37 = vld [vmem:[#allocation3 + $0x60] ss:$16 sps:$4 sm:$0xff]   ;;  %v3965_v40 = vld [vmem:[#allocation3 + $0x84] ss:$16 sps:$4 sm:$0xff]   ;;  %v3984_v3 = vld [vmem:[#allocation6 + $0xf8] sm:$0xff]  }
  0x47   :  { %1227 = vmatprep.subr.bf16.mxu0 %v4286_v0  ;;  %3811 = vmatprep.subr.bf16.mxu1 %v4286_v0  ;;  %v4017_v38 = vld [vmem:[#allocation3 + $0x160] ss:$16 sps:$4 sm:$0xff]   ;;  %v4021_v41 = vld [vmem:[#allocation3 + $0x184] ss:$16 sps:$4 sm:$0xff]   ;;  %v3985_v4 = vld [vmem:[#allocation3 + $0x8] ss:$16 sps:$4 sm:$0xff]  }
  0x48   :  { %v3963_v39 = vld [vmem:[#allocation6 + $0xb0] sm:$0xff]   ;;  %v3968_v45 = vld [vmem:[#allocation6 + $0xc0] sm:$0xff]   ;;  %v3988_v6 = vld [vmem:[#allocation3 + $0x2c] ss:$16 sps:$4 sm:$0xff]  }
  0x49   :  { %v3967_v43 = vld [vmem:[#allocation3 + $0x80] ss:$16 sps:$4 sm:$0xff]   ;;  %v3970_v46 = vld [vmem:[#allocation3 + $0xa4] ss:$16 sps:$4 sm:$0xff]   ;;  %v3996_v15 = vld [vmem:[#allocation3 + $0x68] ss:$16 sps:$4 sm:$0xff]  }
  0x4a   :  { %1228 = vmatpush1.bf16.msra.mxu0 %v3933_v5  ;;  %3827 = vmatpush1.bf16.msra.mxu1 %v3933_v5  ;;  %v4023_v44 = vld [vmem:[#allocation3 + $0x180] ss:$16 sps:$4 sm:$0xff]   ;;  %v4027_v47 = vld [vmem:[#allocation3 + $0x1a4] ss:$16 sps:$4 sm:$0xff]  }
  0x4b   :  { %1229 = vmatprep.subr.bf16.mxu0 %v4286_v0  ;;  %3812 = vmatprep.subr.bf16.mxu1 %v4286_v0  ;;  %v3972_v49 = vld [vmem:[#allocation3 + $0xa0] ss:$16 sps:$4 sm:$0xff]   ;;  %v3975_v52 = vld [vmem:[#allocation3 + $0xc4] ss:$16 sps:$4 sm:$0xff]  }
  0x4c   :  { %v4029_v50 = vld [vmem:[#allocation3 + $0x1a0] ss:$16 sps:$4 sm:$0xff]   ;;  %v4033_v53 = vld [vmem:[#allocation3 + $0x1c4] ss:$16 sps:$4 sm:$0xff]  }
  0x4d   :  { %v3973_v51 = vld [vmem:[#allocation6 + $0xd0] sm:$0xff]   ;;  %v3978_v57 = vld [vmem:[#allocation6 + $0xe0] sm:$0xff]  }
  0x4e   :  { %1230 = vmatpush1.bf16.msra.mxu0 %v3934_v7  ;;  %3828 = vmatpush1.bf16.msra.mxu1 %v3934_v7  ;;  %v3977_v55 = vld [vmem:[#allocation3 + $0xc0] ss:$16 sps:$4 sm:$0xff]   ;;  %v3980_v58 = vld [vmem:[#allocation3 + $0xe4] ss:$16 sps:$4 sm:$0xff]  }
  0x4f   :  { %1231 = vmatprep.subr.bf16.mxu0 %v4286_v0  ;;  %3813 = vmatprep.subr.bf16.mxu1 %v4286_v0  ;;  %v4035_v56 = vld [vmem:[#allocation3 + $0x1c0] ss:$16 sps:$4 sm:$0xff]   ;;  %v4039_v59 = vld [vmem:[#allocation3 + $0x1e4] ss:$16 sps:$4 sm:$0xff]  }
  0x50   :  { %v3982_v61 = vld [vmem:[#allocation3 + $0xe0] ss:$16 sps:$4 sm:$0xff]   ;;  %v4045_v2 = vld [vmem:[#allocation3 + $0x204] ss:$16 sps:$4 sm:$0xff]  }
  0x51   :  { %v4041_v62 = vld [vmem:[#allocation3 + $0x1e0] ss:$16 sps:$4 sm:$0xff]   ;;  %v4051_v7 = vld [vmem:[#allocation3 + $0x224] ss:$16 sps:$4 sm:$0xff]  }
  0x52   :  { %1232 = vmatpush1.bf16.msra.mxu0 %v3935_v8  ;;  %3829 = vmatpush1.bf16.msra.mxu1 %v3935_v8  ;;  %v3983_v63 = vld [vmem:[#allocation6 + $0xf0] sm:$0xff]   ;;  %v3990_v8 = vld [vmem:[#allocation3 + $0x28] ss:$16 sps:$4 sm:$0xff]  }
  0x53   :  { %1233 = vmatprep.subr.bf16.mxu0 %v4286_v0  ;;  %3814 = vmatprep.subr.bf16.mxu1 %v4286_v0  ;;  %v4047_v5 = vld [vmem:[#allocation3 + $0x200] ss:$16 sps:$4 sm:$0xff]  }
  0x56   :  { %1234 = vmatpush1.bf16.msra.mxu0 %v3936_v9  ;;  %3830 = vmatpush1.bf16.msra.mxu1 %v3936_v9  ;;  %v4053_v9 = vld [vmem:[#allocation3 + $0x220] ss:$16 sps:$4 sm:$0xff]  }
  0x57   :  { %1235 = vmatprep.subr.bf16.mxu0 %v4286_v0  ;;  %3815 = vmatprep.subr.bf16.mxu1 %v4286_v0 }
  0x5a   :  { %1236 = vmatpush1.bf16.msra.mxu0 %v3937_v10  ;;  %3831 = vmatpush1.bf16.msra.mxu1 %v3937_v10  ;;  %v3991_v10 = vld [vmem:[#allocation3 + $0x4c] ss:$16 sps:$4 sm:$0xff]  }
  0x5b   :  { %1237 = vmatprep.subr.bf16.mxu0 %v4286_v0  ;;  %3816 = vmatprep.subr.bf16.mxu1 %v4286_v0 }
  0x5e   :  { %1238 = vmatpush1.bf16.msra.mxu0 %v3938_v11  ;;  %3832 = vmatpush1.bf16.msra.mxu1 %v3938_v11  ;;  %v4057_v11 = vld [vmem:[#allocation3 + $0x244] ss:$16 sps:$4 sm:$0xff]  }
  0x5f   :  { %1239 = vmatprep.subr.bf16.mxu0 %v4286_v0  ;;  %3817 = vmatprep.subr.bf16.mxu1 %v4286_v0 }
  0x62   :  { %1240 = vmatpush1.bf16.msra.mxu0 %v3939_v12  ;;  %3833 = vmatpush1.bf16.msra.mxu1 %v3939_v12  ;;  %v3993_v12 = vld [vmem:[#allocation3 + $0x48] ss:$16 sps:$4 sm:$0xff]  }
  0x63   :  { %1241 = vmatprep.subr.bf16.mxu0 %v4286_v0  ;;  %3818 = vmatprep.subr.bf16.mxu1 %v4286_v0 }
  0x66   :  { %1242 = vmatpush1.bf16.msra.mxu0 %v3940_v13  ;;  %3834 = vmatpush1.bf16.msra.mxu1 %v3940_v13  ;;  %v3994_v13 = vld [vmem:[#allocation3 + $0x6c] ss:$16 sps:$4 sm:$0xff]  }
  0x67   :  { %1243 = vmatprep.subr.bf16.mxu0 %v4286_v0  ;;  %3819 = vmatprep.subr.bf16.mxu1 %v4286_v0 }
  0x6a   :  { %1244 = vmatpush1.bf16.msra.mxu0 %v3941_v14  ;;  %3835 = vmatpush1.bf16.msra.mxu1 %v3941_v14  ;;  %v4063_v14 = vld [vmem:[#allocation3 + $0x264] ss:$16 sps:$4 sm:$0xff]  }
  0x6b   :  { %1245 = vmatprep.subr.bf16.mxu0 %v4286_v0  ;;  %3820 = vmatprep.subr.bf16.mxu1 %v4286_v0 }
  0x6e   :  { %1246 = vmatpush1.bf16.msra.mxu0 %v3942_v16  ;;  %3836 = vmatpush1.bf16.msra.mxu1 %v3942_v16  ;;  %v4065_v16 = vld [vmem:[#allocation3 + $0x260] ss:$16 sps:$4 sm:$0xff]  }
  0x6f   :  { %1247 = vmatprep.subr.bf16.mxu0 %v4286_v0  ;;  %3821 = vmatprep.subr.bf16.mxu1 %v4286_v0 }
  0x72   :  { %1248 = vmatpush1.bf16.msra.mxu0 %v3943_v17  ;;  %3837 = vmatpush1.bf16.msra.mxu1 %v3943_v17  ;;  %v4000_v17 = vld [vmem:[#allocation3 + $0x8c] ss:$16 sps:$4 sm:$0xff]  }
  0x73   :  { %1249 = vmatprep.subr.bf16.mxu0 %v4286_v0  ;;  %3822 = vmatprep.subr.bf16.mxu1 %v4286_v0 }
  0x76   :  { %1250 = vmatpush1.bf16.msra.mxu0 %v3944_v18  ;;  %3838 = vmatpush1.bf16.msra.mxu1 %v3944_v18  ;;  %v4069_v18 = vld [vmem:[#allocation3 + $0x284] ss:$16 sps:$4 sm:$0xff]  }
  0x77   :  { %1508 = vmatprep.subr.bf16.mxu0 %v4286_v0 }
  0x79   :  { %1252 = vmatmul.mubr.bf16.vlgmr.msra.gmra.mrb[0].mxu0 %v3945_v19  ;;  %1316 = vmatmul.mubr.bf16.vlgmr.msra.gmra.mrb[0].mxu1 %v3997_v22  ;;  %v4093_v19 = vld [vmem:[#allocation8] sm:$0xff]   ;;  %v4006_v22 = vld [vmem:[#allocation3 + $0xac] ss:$16 sps:$4 sm:$0xff]  }
  0x7a   :  { %1509 = vmatpush1.bf16.msra.mxu0 %v3948_v20  ;;  %1259 = vmatprep.mubr.bf16.mxu0 %v3950_v21  ;;  %v4002_v20 = vld [vmem:[#allocation3 + $0x88] ss:$16 sps:$4 sm:$0xff]   ;;  %v4071_v21 = vld [vmem:[#allocation3 + $0x280] ss:$16 sps:$4 sm:$0xff]  }
  0x7b   :  { %1510 = vmatprep.subr.bf16.mxu0 %v4286_v0  ;;  %1323 = vmatprep.mubr.bf16.mxu1 %v4003_v23  ;;  %v4075_v23 = vld [vmem:[#allocation3 + $0x2a4] ss:$16 sps:$4 sm:$0xff]  }
  0x7c   :  { %3727 = vmatprep.subr.bf16.mxu1 %v4093_v19 }
  0x7d   :  { %3728 = vmatpush3.bf16.msra.mxu1 %v4093_v19  ;;  %v4097_v19 = vld [vmem:[#allocation3 + $0x28c] ss:$16 sps:$4 sm:$0xff]  }
  0x7e   :  { %1511 = vmatpush1.bf16.msra.mxu0 %v3949_v24  ;;  %v4008_v24 = vld [vmem:[#allocation3 + $0xa8] ss:$16 sps:$4 sm:$0xff]  }
  0x7f   :  { %1512 = vmatprep.subr.bf16.mxu0 %v4286_v0 }
  0x81   :  { %1260 = vmatmul.mubr.bf16.gmra.mrb[4].mxu0 %v3952_v25  ;;  %1324 = vmatmul.mubr.bf16.gmra.mrb[4].mxu1 %v4005_v26  ;;  %v4077_v25 = vld [vmem:[#allocation3 + $0x2a0] ss:$16 sps:$4 sm:$0xff]   ;;  %v4012_v26 = vld [vmem:[#allocation3 + $0xcc] ss:$16 sps:$4 sm:$0xff]  }
  0x82   :  { %1513 = vmatpush1.bf16.msra.mxu0 %v3953_v27  ;;  %1267 = vmatprep.mubr.bf16.mxu0 %v3955_v28  ;;  %v4081_v27 = vld [vmem:[#allocation3 + $0x2c4] ss:$16 sps:$4 sm:$0xff]   ;;  %v4014_v28 = vld [vmem:[#allocation3 + $0xc8] ss:$16 sps:$4 sm:$0xff]  }
  0x83   :  { %1514 = vmatprep.subr.bf16.mxu0 %v4286_v0  ;;  %1331 = vmatprep.mubr.bf16.mxu1 %v4009_v29  ;;  %v4083_v29 = vld [vmem:[#allocation3 + $0x2c0] ss:$16 sps:$4 sm:$0xff]  }
  0x86   :  { %1515 = vmatpush1.bf16.msra.mxu0 %v3954_v30  ;;  %v4018_v30 = vld [vmem:[#allocation3 + $0xec] ss:$16 sps:$4 sm:$0xff]  }
  0x87   :  { %1516 = vmatprep.subr.bf16.mxu0 %v4286_v0 }
  0x89   :  { %1268 = vmatmul.mubr.bf16.gmra.mrb[8].mxu0 %v3957_v31  ;;  %1332 = vmatmul.mubr.bf16.gmra.mrb[8].mxu1 %v4011_v32  ;;  %v4087_v31 = vld [vmem:[#allocation3 + $0x2e4] ss:$16 sps:$4 sm:$0xff]   ;;  %v4112_v32 = vld [vmem:[#allocation8 + $0x8] sm:$0xff]  }
  0x8a   :  { %1517 = vmatpush1.bf16.msra.mxu0 %v3958_v33  ;;  %1275 = vmatprep.mubr.bf16.mxu0 %v3960_v34  ;;  %v4020_v33 = vld [vmem:[#allocation3 + $0xe8] ss:$16 sps:$4 sm:$0xff]   ;;  %v4089_v34 = vld [vmem:[#allocation3 + $0x2e0] ss:$16 sps:$4 sm:$0xff]  }
  0x8b   :  { %1518 = vmatprep.subr.bf16.mxu0 %v4286_v0  ;;  %1339 = vmatprep.mubr.bf16.mxu1 %v4015_v35  ;;  %v4024_v35 = vld [vmem:[#allocation3 + $0x10c] ss:$16 sps:$4 sm:$0xff]  }
  0x8c   :  { %3729 = vmatprep.subr.bf16.mxu1 %v4112_v32 }
  0x8d   :  { %3730 = vmatpush3.bf16.msra.mxu1 %v4112_v32 }
  0x8e   :  { %1519 = vmatpush1.bf16.msra.mxu0 %v3959_v36  ;;  %v4094_v36 = vld [vmem:[#allocation3 + $0x304] ss:$16 sps:$4 sm:$0xff]  }
  0x8f   :  { %1520 = vmatprep.subr.bf16.mxu0 %v4286_v0 }
  0x91   :  { %1276 = vmatmul.mubr.bf16.gmra.mrb[12].mxu0 %v3962_v37  ;;  %1340 = vmatmul.mubr.bf16.gmra.mrb[12].mxu1 %v4017_v38  ;;  %v4026_v37 = vld [vmem:[#allocation3 + $0x108] ss:$16 sps:$4 sm:$0xff]   ;;  %v4096_v38 = vld [vmem:[#allocation3 + $0x300] ss:$16 sps:$4 sm:$0xff]  }
  0x92   :  { %1521 = vmatpush1.bf16.msra.mxu0 %v3963_v39  ;;  %1283 = vmatprep.mubr.bf16.mxu0 %v3965_v40  ;;  %v4030_v39 = vld [vmem:[#allocation3 + $0x12c] ss:$16 sps:$4 sm:$0xff]   ;;  %v4100_v40 = vld [vmem:[#allocation3 + $0x324] ss:$16 sps:$4 sm:$0xff]  }
  0x93   :  { %1522 = vmatprep.subr.bf16.mxu0 %v4286_v0  ;;  %1347 = vmatprep.mubr.bf16.mxu1 %v4021_v41  ;;  %v4032_v41 = vld [vmem:[#allocation3 + $0x128] ss:$16 sps:$4 sm:$0xff]  }
  0x96   :  { %1523 = vmatpush1.bf16.msra.mxu0 %v3964_v42  ;;  %v4102_v42 = vld [vmem:[#allocation3 + $0x320] ss:$16 sps:$4 sm:$0xff]  }
  0x97   :  { %1524 = vmatprep.subr.bf16.mxu0 %v4286_v0 }
  0x99   :  { %1284 = vmatmul.mubr.bf16.gmra.mrb[16].mxu0 %v3967_v43  ;;  %1348 = vmatmul.mubr.bf16.gmra.mrb[16].mxu1 %v4023_v44  ;;  %v4036_v43 = vld [vmem:[#allocation3 + $0x14c] ss:$16 sps:$4 sm:$0xff]   ;;  %v4106_v44 = vld [vmem:[#allocation3 + $0x344] ss:$16 sps:$4 sm:$0xff]  }
  0x9a   :  { %1525 = vmatpush1.bf16.msra.mxu0 %v3968_v45  ;;  %1291 = vmatprep.mubr.bf16.mxu0 %v3970_v46  ;;  %v4131_v45 = vld [vmem:[#allocation8 + $0x10] sm:$0xff]   ;;  %v4132_v46 = vld [vmem:[#allocation8 + $0x18] sm:$0xff]  }
  0x9b   :  { %1526 = vmatprep.subr.bf16.mxu0 %v4286_v0  ;;  %1355 = vmatprep.mubr.bf16.mxu1 %v4027_v47  ;;  %v4038_v47 = vld [vmem:[#allocation3 + $0x148] ss:$16 sps:$4 sm:$0xff]  }
  0x9c   :  { %3731 = vmatprep.subr.bf16.mxu1 %v4131_v45 }
  0x9d   :  { %3732 = vmatpush3.bf16.msra.mxu1 %v4131_v45 }
  0x9e   :  { %1527 = vmatpush1.bf16.msra.mxu0 %v3969_v48  ;;  %v4108_v48 = vld [vmem:[#allocation3 + $0x340] ss:$16 sps:$4 sm:$0xff]   ;;  %3733 = vmatprep.subr.bf16.mxu1 %v4132_v46 }
  0x9f   :  { %1528 = vmatprep.subr.bf16.mxu0 %v4286_v0 }
  0xa1   :  { %1292 = vmatmul.mubr.bf16.gmra.mrb[20].mxu0 %v3972_v49  ;;  %1356 = vmatmul.mubr.bf16.gmra.mrb[20].mxu1 %v4029_v50  ;;  %v4042_v49 = vld [vmem:[#allocation3 + $0x16c] ss:$16 sps:$4 sm:$0xff]   ;;  %v4113_v50 = vld [vmem:[#allocation3 + $0x364] ss:$16 sps:$4 sm:$0xff]  }
  0xa2   :  { %1529 = vmatpush1.bf16.msra.mxu0 %v3973_v51  ;;  %1299 = vmatprep.mubr.bf16.mxu0 %v3975_v52  ;;  %v4139_v51 = vld [vmem:[#allocation8 + $0x20] sm:$0xff]   ;;  %v4140_v52 = vld [vmem:[#allocation8 + $0x28] sm:$0xff]  }
  0xa3   :  { %1530 = vmatprep.subr.bf16.mxu0 %v4286_v0  ;;  %1363 = vmatprep.mubr.bf16.mxu1 %v4033_v53  ;;  %v4044_v53 = vld [vmem:[#allocation3 + $0x168] ss:$16 sps:$4 sm:$0xff]  }
  0xa4   :  { %3734 = vmatpush3.bf16.msra.mxu1 %v4132_v46 }
  0xa5   :  { %3735 = vmatprep.subr.bf16.mxu1 %v4139_v51 }
  0xa6   :  { %1531 = vmatpush1.bf16.msra.mxu0 %v3974_v54  ;;  %v4115_v54 = vld [vmem:[#allocation3 + $0x360] ss:$16 sps:$4 sm:$0xff]  }
  0xa7   :  { %1532 = vmatprep.subr.bf16.mxu0 %v4286_v0 }
  0xa8   :  { %3736 = vmatpush3.bf16.msra.mxu1 %v4139_v51 }
  0xa9   :  { %1300 = vmatmul.mubr.bf16.gmra.mrb[24].mxu0 %v3977_v55  ;;  %1364 = vmatmul.mubr.bf16.gmra.mrb[24].mxu1 %v4035_v56  ;;  %v4048_v55 = vld [vmem:[#allocation3 + $0x18c] ss:$16 sps:$4 sm:$0xff]   ;;  %v4119_v56 = vld [vmem:[#allocation3 + $0x384] ss:$16 sps:$4 sm:$0xff]  }
  0xaa   :  { %1533 = vmatpush1.bf16.msra.mxu0 %v3978_v57  ;;  %1307 = vmatprep.mubr.bf16.mxu0 %v3980_v58  ;;  %v4147_v57 = vld [vmem:[#allocation8 + $0x30] sm:$0xff]   ;;  %v4148_v58 = vld [vmem:[#allocation8 + $0x38] sm:$0xff]  }
  0xab   :  { %1534 = vmatprep.subr.bf16.mxu0 %v4286_v0  ;;  %1371 = vmatprep.mubr.bf16.mxu1 %v4039_v59  ;;  %v4050_v59 = vld [vmem:[#allocation3 + $0x188] ss:$16 sps:$4 sm:$0xff]  }
  0xac   :  { %3737 = vmatprep.subr.bf16.mxu1 %v4140_v52 }
  0xad   :  { %3738 = vmatpush3.bf16.msra.mxu1 %v4140_v52 }
  0xae   :  { %1535 = vmatpush1.bf16.msra.mxu0 %v3979_v60  ;;  %3739 = vmatprep.subr.bf16.mxu1 %v4147_v57  ;;  %v4121_v60 = vld [vmem:[#allocation3 + $0x380] ss:$16 sps:$4 sm:$0xff]  }
  0xaf   :  { %1536 = vmatprep.subr.bf16.mxu0 %v4286_v0 }
  0xb1   :  { %1308 = vmatmul.mubr.bf16.gmra.mrb[28].mxu0 %v3982_v61  ;;  %1372 = vmatmul.mubr.bf16.gmra.mrb[28].mxu1 %v4041_v62  ;;  %v4054_v61 = vld [vmem:[#allocation3 + $0x1ac] ss:$16 sps:$4 sm:$0xff]   ;;  %v4125_v62 = vld [vmem:[#allocation3 + $0x3a4] ss:$16 sps:$4 sm:$0xff]  }
  0xb2   :  { %1537 = vmatpush1.bf16.msra.mxu0 %v3983_v63  ;;  %1540 = vmatprep.mubr.bf16.mxu0 %v3987_v1  ;;  %v4056_v63 = vld [vmem:[#allocation3 + $0x1a8] ss:$16 sps:$4 sm:$0xff]   ;;  %v4127_v1 = vld [vmem:[#allocation3 + $0x3a0] ss:$16 sps:$4 sm:$0xff]  }
  0xb3   :  { %1538 = vmatprep.subr.bf16.mxu0 %v4286_v0  ;;  %1379 = vmatprep.mubr.bf16.mxu1 %v4045_v2  ;;  %v4059_v0 = vld [vmem:[#allocation3 + $0x240] ss:$16 sps:$4 sm:$0xff]   ;;  %v4060_v2 = vld [vmem:[#allocation3 + $0x1cc] ss:$16 sps:$4 sm:$0xff]  }
  0xb4   :  { %3740 = vmatpush3.bf16.msra.mxu1 %v4147_v57 }
  0xb5   :  { %3741 = vmatprep.subr.bf16.mxu1 %v4148_v58 }
  0xb6   :  { %1539 = vmatpush1.bf16.msra.mxu0 %v3984_v3  ;;  %v4133_v3 = vld [vmem:[#allocation3 + $0x3c4] ss:$16 sps:$4 sm:$0xff]  }
  0xb8   :  { %3742 = vmatpush3.bf16.msra.mxu1 %v4148_v58 }
  0xb9   :  { %1541 = vmatmul.mubr.bf16.vlgmr.msra.gmra.mrb[0].mxu0 %v3985_v4  ;;  %1380 = vmatmul.mubr.bf16.gmra.mrb[32].mxu1 %v4047_v5  ;;  %v4062_v4 = vld [vmem:[#allocation3 + $0x1c8] ss:$16 sps:$4 sm:$0xff]   ;;  %v4135_v5 = vld [vmem:[#allocation3 + $0x3c0] ss:$16 sps:$4 sm:$0xff]  }
  0xba   :  { %1548 = vmatprep.mubr.bf16.mxu0 %v3988_v6  ;;  %1387 = vmatprep.mubr.bf16.mxu1 %v4051_v7  ;;  %v4066_v6 = vld [vmem:[#allocation3 + $0x1ec] ss:$16 sps:$4 sm:$0xff]   ;;  %v4141_v7 = vld [vmem:[#allocation3 + $0x3e4] ss:$16 sps:$4 sm:$0xff]  }
  0xc1   :  { %1549 = vmatmul.mubr.bf16.gmra.mrb[4].mxu0 %v3990_v8  ;;  %1388 = vmatmul.mubr.bf16.gmra.mrb[36].mxu1 %v4053_v9  ;;  %v4068_v8 = vld [vmem:[#allocation3 + $0x1e8] ss:$16 sps:$4 sm:$0xff]   ;;  %v4143_v9 = vld [vmem:[#allocation3 + $0x3e0] ss:$16 sps:$4 sm:$0xff]  }
  0xc2   :  { %1556 = vmatprep.mubr.bf16.mxu0 %v3991_v10  ;;  %1395 = vmatprep.mubr.bf16.mxu1 %v4057_v11  ;;  %v4072_v10 = vld [vmem:[#allocation3 + $0x20c] ss:$16 sps:$4 sm:$0xff]   ;;  %v4074_v11 = vld [vmem:[#allocation3 + $0x208] ss:$16 sps:$4 sm:$0xff]  }
  0xc9   :  { %1557 = vmatmul.mubr.bf16.gmra.mrb[8].mxu0 %v3993_v12  ;;  %1396 = vmatmul.mubr.bf16.gmra.mrb[40].mxu1 %v4059_v0  ;;  %v4078_v12 = vld [vmem:[#allocation3 + $0x22c] ss:$16 sps:$4 sm:$0xff]   ;;  %v4080_v0 = vld [vmem:[#allocation3 + $0x228] ss:$16 sps:$4 sm:$0xff]  }
  0xca   :  { %1564 = vmatprep.mubr.bf16.mxu0 %v3994_v13  ;;  %1403 = vmatprep.mubr.bf16.mxu1 %v4063_v14  ;;  %v4084_v13 = vld [vmem:[#allocation3 + $0x24c] ss:$16 sps:$4 sm:$0xff]   ;;  %v4086_v14 = vld [vmem:[#allocation3 + $0x248] ss:$16 sps:$4 sm:$0xff]  }
  0xd1   :  { %1565 = vmatmul.mubr.bf16.gmra.mrb[12].mxu0 %v3996_v15  ;;  %1404 = vmatmul.mubr.bf16.gmra.mrb[44].mxu1 %v4065_v16  ;;  %v4090_v15 = vld [vmem:[#allocation3 + $0x26c] ss:$16 sps:$4 sm:$0xff]  }
  0xd2   :  { %1572 = vmatprep.mubr.bf16.mxu0 %v4000_v17  ;;  %1411 = vmatprep.mubr.bf16.mxu1 %v4069_v18  ;;  %v4092_v17 = vld [vmem:[#allocation3 + $0x268] ss:$16 sps:$4 sm:$0xff]  }
  0xd9   :  { %1573 = vmatmul.mubr.bf16.gmra.mrb[16].mxu0 %v4002_v20  ;;  %1412 = vmatmul.mubr.bf16.gmra.mrb[48].mxu1 %v4071_v21 }
  0xda   :  { %1580 = vmatprep.mubr.bf16.mxu0 %v4006_v22  ;;  %1419 = vmatprep.mubr.bf16.mxu1 %v4075_v23  ;;  %v4099_v23 = vld [vmem:[#allocation3 + $0x288] ss:$16 sps:$4 sm:$0xff]  }
  0xe1   :  { %1581 = vmatmul.mubr.bf16.gmra.mrb[20].mxu0 %v4008_v24  ;;  %1420 = vmatmul.mubr.bf16.gmra.mrb[52].mxu1 %v4077_v25  ;;  %v4103_v25 = vld [vmem:[#allocation3 + $0x2ac] ss:$16 sps:$4 sm:$0xff]  }
  0xe2   :  { %1588 = vmatprep.mubr.bf16.mxu0 %v4012_v26  ;;  %1427 = vmatprep.mubr.bf16.mxu1 %v4081_v27 }
  0xe9   :  { %1589 = vmatmul.mubr.bf16.gmra.mrb[24].mxu0 %v4014_v28  ;;  %1428 = vmatmul.mubr.bf16.gmra.mrb[56].mxu1 %v4083_v29  ;;  %v4105_v29 = vld [vmem:[#allocation3 + $0x2a8] ss:$16 sps:$4 sm:$0xff]  }
  0xea   :  { %1596 = vmatprep.mubr.bf16.mxu0 %v4018_v30  ;;  %1435 = vmatprep.mubr.bf16.mxu1 %v4087_v31  ;;  %v4109_v31 = vld [vmem:[#allocation3 + $0x2cc] ss:$16 sps:$4 sm:$0xff]  }
  0xf1   :  { %1597 = vmatmul.mubr.bf16.gmra.mrb[28].mxu0 %v4020_v33  ;;  %1436 = vmatmul.mubr.bf16.gmra.mrb[60].mxu1 %v4089_v34 }
  0xf2   :  { %1604 = vmatprep.mubr.bf16.mxu0 %v4024_v35  ;;  %1443 = vmatprep.mubr.bf16.mxu1 %v4094_v36  ;;  %v4111_v35 = vld [vmem:[#allocation3 + $0x2c8] ss:$16 sps:$4 sm:$0xff]  }
  0xf9   :  { %1605 = vmatmul.mubr.bf16.gmra.mrb[32].mxu0 %v4026_v37  ;;  %1444 = vmatmul.mubr.bf16.gmra.mrb[64].mxu1 %v4096_v38  ;;  %v4116_v37 = vld [vmem:[#allocation3 + $0x2ec] ss:$16 sps:$4 sm:$0xff]  }
  0xfa   :  { %1612 = vmatprep.mubr.bf16.mxu0 %v4030_v39  ;;  %1451 = vmatprep.mubr.bf16.mxu1 %v4100_v40 }
 0x101   :  { %1613 = vmatmul.mubr.bf16.gmra.mrb[36].mxu0 %v4032_v41  ;;  %1452 = vmatmul.mubr.bf16.gmra.mrb[68].mxu1 %v4102_v42  ;;  %v4118_v41 = vld [vmem:[#allocation3 + $0x2e8] ss:$16 sps:$4 sm:$0xff]  }
 0x102   :  { %1620 = vmatprep.mubr.bf16.mxu0 %v4036_v43  ;;  %1459 = vmatprep.mubr.bf16.mxu1 %v4106_v44  ;;  %v4122_v43 = vld [vmem:[#allocation3 + $0x30c] ss:$16 sps:$4 sm:$0xff]  }
 0x109   :  { %1621 = vmatmul.mubr.bf16.gmra.mrb[40].mxu0 %v4038_v47  ;;  %1460 = vmatmul.mubr.bf16.gmra.mrb[72].mxu1 %v4108_v48  ;;  %v4124_v47 = vld [vmem:[#allocation3 + $0x308] ss:$16 sps:$4 sm:$0xff]  }
 0x10a   :  { %1628 = vmatprep.mubr.bf16.mxu0 %v4042_v49  ;;  %1467 = vmatprep.mubr.bf16.mxu1 %v4113_v50  ;;  %v4128_v49 = vld [vmem:[#allocation3 + $0x32c] ss:$16 sps:$4 sm:$0xff]  }
 0x111   :  { %1629 = vmatmul.mubr.bf16.gmra.mrb[44].mxu0 %v4044_v53  ;;  %1468 = vmatmul.mubr.bf16.gmra.mrb[76].mxu1 %v4115_v54  ;;  %v4130_v53 = vld [vmem:[#allocation3 + $0x328] ss:$16 sps:$4 sm:$0xff]  }
 0x112   :  { %1636 = vmatprep.mubr.bf16.mxu0 %v4048_v55  ;;  %1475 = vmatprep.mubr.bf16.mxu1 %v4119_v56  ;;  %v4136_v55 = vld [vmem:[#allocation3 + $0x34c] ss:$16 sps:$4 sm:$0xff]  }
 0x119   :  { %1637 = vmatmul.mubr.bf16.gmra.mrb[48].mxu0 %v4050_v59  ;;  %1476 = vmatmul.mubr.bf16.gmra.mrb[80].mxu1 %v4121_v60  ;;  %v4138_v59 = vld [vmem:[#allocation3 + $0x348] ss:$16 sps:$4 sm:$0xff]  }
 0x11a   :  { %1644 = vmatprep.mubr.bf16.mxu0 %v4054_v61  ;;  %1483 = vmatprep.mubr.bf16.mxu1 %v4125_v62  ;;  %v4144_v61 = vld [vmem:[#allocation3 + $0x36c] ss:$16 sps:$4 sm:$0xff]  }
 0x121   :  { %1645 = vmatmul.mubr.bf16.gmra.mrb[52].mxu0 %v4056_v63  ;;  %1484 = vmatmul.mubr.bf16.gmra.mrb[84].mxu1 %v4127_v1 }
 0x122   :  { %1652 = vmatprep.mubr.bf16.mxu0 %v4060_v2  ;;  %1491 = vmatprep.mubr.bf16.mxu1 %v4133_v3 }
 0x129   :  { %1653 = vmatmul.mubr.bf16.gmra.mrb[56].mxu0 %v4062_v4  ;;  %1492 = vmatmul.mubr.bf16.gmra.mrb[88].mxu1 %v4135_v5  ;;  %v4146_v4 = vld [vmem:[#allocation3 + $0x368] ss:$16 sps:$4 sm:$0xff]  }
 0x12a   :  { %1660 = vmatprep.mubr.bf16.mxu0 %v4066_v6  ;;  %1499 = vmatprep.mubr.bf16.mxu1 %v4141_v7  ;;  %v4149_v7 = vld [vmem:[#allocation3 + $0x38c] ss:$16 sps:$4 sm:$0xff]  }
 0x131   :  { %1661 = vmatmul.mubr.bf16.gmra.mrb[60].mxu0 %v4068_v8  ;;  %1500 = vmatmul.mubr.bf16.gmra.mrb[92].mxu1 %v4143_v9 }
 0x132   :  { %1668 = vmatprep.mubr.bf16.mxu0 %v4072_v10 }
 0x139   :  { %1669 = vmatmul.mubr.bf16.gmra.mrb[64].mxu0 %v4074_v11 }
 0x13a   :  { %1676 = vmatprep.mubr.bf16.mxu0 %v4078_v12 }
 0x141   :  { %1677 = vmatmul.mubr.bf16.gmra.mrb[68].mxu0 %v4080_v0 }
 0x142   :  { %1684 = vmatprep.mubr.bf16.mxu0 %v4084_v13 }
 0x149   :  { %1685 = vmatmul.mubr.bf16.gmra.mrb[72].mxu0 %v4086_v14  ;;  %v4151_v14 = vld [vmem:[#allocation3 + $0x388] ss:$16 sps:$4 sm:$0xff]  }
 0x14a   :  { %1692 = vmatprep.mubr.bf16.mxu0 %v4090_v15 }
 0x14c   :  { %v4409_v16 = vpop.f32.mrb[0].mxu1 }
 0x14d   :  { %v1319_v18 = vpop.f32.mrb[1].mxu1 }
 0x14e   :  { %v4411_v20 = vpop.f32.mrb[2].mxu1  ;;  %v4152_v18 = vld [vmem:[#allocation3 + $0x3ac] ss:$16 sps:$4 sm:$0xff]  }
 0x14f   :  { %v1322_v21 = vpop.f32.mrb[3].mxu1 }
 0x151   :  { %1693 = vmatmul.mubr.bf16.gmra.mrb[76].mxu0 %v4092_v17 }
 0x152   :  { %1700 = vmatprep.mubr.bf16.mxu0 %v4097_v19 }
 0x154   :  { %v4413_v22 = vpop.f32.mrb[4].mxu1 }
 0x155   :  { %v1327_v24 = vpop.f32.mrb[5].mxu1 }
 0x156   :  { %v4415_v26 = vpop.f32.mrb[6].mxu1 }
 0x157   :  { %v1330_v27 = vpop.f32.mrb[7].mxu1 }
 0x159   :  { %1701 = vmatmul.mubr.bf16.gmra.mrb[80].mxu0 %v4099_v23 }
 0x15a   :  { %1708 = vmatprep.mubr.bf16.mxu0 %v4103_v25 }
 0x15c   :  { %v4417_v28 = vpop.f32.mrb[8].mxu1 }
 0x15d   :  { %v1335_v30 = vpop.f32.mrb[9].mxu1 }
 0x15e   :  { %v4419_v32 = vpop.f32.mrb[10].mxu1  ;;  %v4154_v30 = vld [vmem:[#allocation3 + $0x3a8] ss:$16 sps:$4 sm:$0xff]  }
 0x15f   :  { %v1338_v33 = vpop.f32.mrb[11].mxu1 }
 0x161   :  { %1709 = vmatmul.mubr.bf16.gmra.mrb[84].mxu0 %v4105_v29 }
 0x162   :  { %1716 = vmatprep.mubr.bf16.mxu0 %v4109_v31 }
 0x164   :  { %v4421_v34 = vpop.f32.mrb[12].mxu1 }
 0x165   :  { %v1343_v36 = vpop.f32.mrb[13].mxu1 }
 0x166   :  { %v4423_v38 = vpop.f32.mrb[14].mxu1 }
 0x167   :  { %v1346_v39 = vpop.f32.mrb[15].mxu1 }
 0x169   :  { %1717 = vmatmul.mubr.bf16.gmra.mrb[88].mxu0 %v4111_v35  ;;  %v4155_v35 = vld [vmem:[#allocation3 + $0x3cc] ss:$16 sps:$4 sm:$0xff]  }
 0x16a   :  { %1724 = vmatprep.mubr.bf16.mxu0 %v4116_v37 }
 0x16c   :  { %v4425_v40 = vpop.f32.mrb[16].mxu1 }
 0x16d   :  { %v1351_v42 = vpop.f32.mrb[17].mxu1 }
 0x16e   :  { %v4427_v44 = vpop.f32.mrb[18].mxu1 }
 0x16f   :  { %v1354_v45 = vpop.f32.mrb[19].mxu1 }
 0x171   :  { %1725 = vmatmul.mubr.bf16.gmra.mrb[92].mxu0 %v4118_v41 }
 0x172   :  { %1732 = vmatprep.mubr.bf16.mxu0 %v4122_v43 }
 0x174   :  { %v4429_v46 = vpop.f32.mrb[20].mxu1 }
 0x175   :  { %v1359_v48 = vpop.f32.mrb[21].mxu1 }
 0x176   :  { %v4431_v50 = vpop.f32.mrb[22].mxu1 }
 0x177   :  { %v1362_v51 = vpop.f32.mrb[23].mxu1 }
 0x178   :  { %v4158_v51 = vld [vmem:[#allocation3 + $0x3ec] ss:$16 sps:$4 sm:$0xff]  }
 0x179   :  { %1733 = vmatmul.mubr.bf16.gmra.mrb[96].mxu0 %v4124_v47  ;;  %v4157_v47 = vld [vmem:[#allocation3 + $0x3c8] ss:$16 sps:$4 sm:$0xff]  }
 0x17a   :  { %1740 = vmatprep.mubr.bf16.mxu0 %v4128_v49 }
 0x17c   :  { %v4433_v52 = vpop.f32.mrb[24].mxu1 }
 0x17d   :  { %v1367_v54 = vpop.f32.mrb[25].mxu1 }
 0x17e   :  { %v4435_v56 = vpop.f32.mrb[26].mxu1 }
 0x17f   :  { %v1370_v57 = vpop.f32.mrb[27].mxu1 }
 0x181   :  { %1741 = vmatmul.mubr.bf16.gmra.mrb[100].mxu0 %v4130_v53 }
 0x182   :  { %1748 = vmatprep.mubr.bf16.mxu0 %v4136_v55 }
 0x184   :  { %v4437_v58 = vpop.f32.mrb[28].mxu1 }
 0x185   :  { %v1375_v60 = vpop.f32.mrb[29].mxu1 }
 0x186   :  { %v4439_v62 = vpop.f32.mrb[30].mxu1 }
 0x187   :  { %v1378_v63 = vpop.f32.mrb[31].mxu1 }
 0x188   :  { %v4160_v63 = vld [vmem:[#allocation3 + $0x3e8] ss:$16 sps:$4 sm:$0xff]  }
 0x189   :  { %1749 = vmatmul.mubr.bf16.gmra.mrb[104].mxu0 %v4138_v59 }
 0x18a   :  { %1756 = vmatprep.mubr.bf16.mxu0 %v4144_v61 }
 0x18c   :  { %v1542_v1 = vpop.f32.mrb[0].mxu0  ;;  %v4441_v2 = vpop.f32.mrb[32].mxu1 }
 0x18d   :  { %v1544_v3 = vpop.f32.mrb[1].mxu0  ;;  %v1383_v5 = vpop.f32.mrb[33].mxu1 }
 0x18e   :  { %v1545_v6 = vpop.f32.mrb[2].mxu0  ;;  %v4443_v8 = vpop.f32.mrb[34].mxu1 }
 0x18f   :  { %v1992_v9 = vpack.c.bf16 %v1545_v6, %v1542_v1  ;;  %v1547_v10 = vpop.f32.mrb[3].mxu0  ;;  %v1386_v11 = vpop.f32.mrb[35].mxu1 }
 0x191   :  { %1757 = vmatmul.mubr.bf16.gmra.mrb[108].mxu0 %v4146_v4  ;;  %3743 = vmatprep.mubr.bf16.mxu1 %v1992_v9 }
 0x192   :  { %1764 = vmatprep.mubr.bf16.mxu0 %v4149_v7 }
 0x194   :  { %v1550_v12 = vpop.f32.mrb[4].mxu0  ;;  %v4445_v0 = vpop.f32.mrb[36].mxu1 }
 0x195   :  { %v1552_v13 = vpop.f32.mrb[5].mxu0  ;;  %v1391_v15 = vpop.f32.mrb[37].mxu1 }
 0x196   :  { %v1553_v17 = vpop.f32.mrb[6].mxu0  ;;  %v4447_v19 = vpop.f32.mrb[38].mxu1 }
 0x197   :  { %v1993_v21 = vpack.c.bf16 %v1553_v17, %v1550_v12  ;;  %v1555_v23 = vpop.f32.mrb[7].mxu0  ;;  %v1394_v24 = vpop.f32.mrb[39].mxu1 }
 0x199   :  { %1765 = vmatmul.mubr.bf16.gmra.mrb[112].mxu0 %v4151_v14  ;;  %3744 = vmatmul.mubr.bf16.vlgmr.msra.gmra.mrb[96].mxu1 %v1993_v21 }
 0x19a   :  { %1772 = vmatprep.mubr.bf16.mxu0 %v4152_v18 }
 0x19c   :  { %v1558_v25 = vpop.f32.mrb[8].mxu0  ;;  %v4449_v27 = vpop.f32.mrb[40].mxu1 }
 0x19d   :  { %v1560_v29 = vpop.f32.mrb[9].mxu0  ;;  %v1399_v31 = vpop.f32.mrb[41].mxu1 }
 0x19e   :  { %v1561_v33 = vpop.f32.mrb[10].mxu0  ;;  %v4451_v36 = vpop.f32.mrb[42].mxu1 }
 0x19f   :  { %v1994_v37 = vpack.c.bf16 %v1561_v33, %v1558_v25  ;;  %v1563_v39 = vpop.f32.mrb[11].mxu0  ;;  %v1402_v41 = vpop.f32.mrb[43].mxu1 }
 0x1a1   :  { %1773 = vmatmul.mubr.bf16.gmra.mrb[116].mxu0 %v4154_v30  ;;  %3747 = vmatprep.mubr.bf16.mxu1 %v1994_v37 }
 0x1a2   :  { %1780 = vmatprep.mubr.bf16.mxu0 %v4155_v35 }
 0x1a4   :  { %v1566_v42 = vpop.f32.mrb[12].mxu0  ;;  %v4453_v43 = vpop.f32.mrb[44].mxu1 }
 0x1a5   :  { %v1568_v45 = vpop.f32.mrb[13].mxu0  ;;  %v1407_v48 = vpop.f32.mrb[45].mxu1 }
 0x1a6   :  { %v1569_v49 = vpop.f32.mrb[14].mxu0  ;;  %v4455_v53 = vpop.f32.mrb[46].mxu1 }
 0x1a7   :  { %v1995_v54 = vpack.c.bf16 %v1569_v49, %v1566_v42  ;;  %v1571_v55 = vpop.f32.mrb[15].mxu0  ;;  %v1410_v57 = vpop.f32.mrb[47].mxu1 }
 0x1a9   :  { %1781 = vmatmul.mubr.bf16.gmra.mrb[120].mxu0 %v4157_v47  ;;  %3748 = vmatmul.mubr.bf16.gmra.mrb[100].mxu1 %v1995_v54 }
 0x1aa   :  { %1788 = vmatprep.mubr.bf16.mxu0 %v4158_v51 }
 0x1ac   :  { %v1574_v59 = vpop.f32.mrb[16].mxu0  ;;  %v4457_v60 = vpop.f32.mrb[48].mxu1 }
 0x1ad   :  { %v1576_v61 = vpop.f32.mrb[17].mxu0  ;;  %v1415_v1 = vpop.f32.mrb[49].mxu1 }
 0x1ae   :  { %v1577_v3 = vpop.f32.mrb[18].mxu0  ;;  %v4459_v4 = vpop.f32.mrb[50].mxu1 }
 0x1af   :  { %v1996_v5 = vpack.c.bf16 %v1577_v3, %v1574_v59  ;;  %v1579_v6 = vpop.f32.mrb[19].mxu0  ;;  %v1418_v7 = vpop.f32.mrb[51].mxu1 }
 0x1b1   :  { %1789 = vmatmul.mubr.bf16.gmra.mrb[124].mxu0 %v4160_v63  ;;  %3751 = vmatprep.mubr.bf16.mxu1 %v1996_v5 }
 0x1b4   :  { %v1582_v9 = vpop.f32.mrb[20].mxu0  ;;  %v4461_v10 = vpop.f32.mrb[52].mxu1 }
 0x1b5   :  { %v1584_v11 = vpop.f32.mrb[21].mxu0  ;;  %v1423_v12 = vpop.f32.mrb[53].mxu1 }
 0x1b6   :  { %v1585_v13 = vpop.f32.mrb[22].mxu0  ;;  %v4463_v14 = vpop.f32.mrb[54].mxu1 }
 0x1b7   :  { %v1997_v15 = vpack.c.bf16 %v1585_v13, %v1582_v9  ;;  %v1587_v17 = vpop.f32.mrb[23].mxu0  ;;  %v1426_v18 = vpop.f32.mrb[55].mxu1 }
 0x1b9   :  { %3752 = vmatmul.mubr.bf16.gmra.mrb[104].mxu1 %v1997_v15 }
 0x1bc   :  { %v1590_v21 = vpop.f32.mrb[24].mxu0  ;;  %v4465_v23 = vpop.f32.mrb[56].mxu1 }
 0x1bd   :  { %v1592_v24 = vpop.f32.mrb[25].mxu0  ;;  %v1431_v25 = vpop.f32.mrb[57].mxu1 }
 0x1be   :  { %v1593_v29 = vpop.f32.mrb[26].mxu0  ;;  %v4467_v30 = vpop.f32.mrb[58].mxu1 }
 0x1bf   :  { %v1998_v31 = vpack.c.bf16 %v1593_v29, %v1590_v21  ;;  %v1595_v33 = vpop.f32.mrb[27].mxu0  ;;  %v1434_v35 = vpop.f32.mrb[59].mxu1 }
 0x1c1   :  { %3755 = vmatprep.mubr.bf16.mxu1 %v1998_v31 }
 0x1c4   :  { %v1598_v37 = vpop.f32.mrb[28].mxu0  ;;  %v4469_v39 = vpop.f32.mrb[60].mxu1 }
 0x1c5   :  { %v1600_v41 = vpop.f32.mrb[29].mxu0  ;;  %v1439_v42 = vpop.f32.mrb[61].mxu1 }
 0x1c6   :  { %v1601_v45 = vpop.f32.mrb[30].mxu0  ;;  %v4471_v47 = vpop.f32.mrb[62].mxu1 }
 0x1c7   :  { %v1999_v48 = vpack.c.bf16 %v1601_v45, %v1598_v37  ;;  %v1603_v49 = vpop.f32.mrb[31].mxu0  ;;  %v1442_v51 = vpop.f32.mrb[63].mxu1 }
 0x1c9   :  { %3756 = vmatmul.mubr.bf16.gmra.mrb[108].mxu1 %v1999_v48 }
 0x1cc   :  { %v1606_v54 = vpop.f32.mrb[32].mxu0  ;;  %v4473_v55 = vpop.f32.mrb[64].mxu1 }
 0x1cd   :  { %v1607_v57 = vadd.f32 %v1606_v54, %v4409_v16  ;;  %v1608_v59 = vpop.f32.mrb[33].mxu0  ;;  %v1447_v61 = vpop.f32.mrb[65].mxu1 }
 0x1ce   :  { %v1609_v63 = vpop.f32.mrb[34].mxu0  ;;  %v4476_v1 = vpop.f32.mrb[66].mxu1 }
 0x1cf   :  { %v1610_v3 = vadd.f32 %v1609_v63, %v4411_v20  ;;  %v1611_v5 = vpop.f32.mrb[35].mxu0  ;;  %v1450_v6 = vpop.f32.mrb[67].mxu1 }
 0x1d1   :  { %v2000_v7 = vpack.c.bf16 %v1610_v3, %v1607_v57 }
 0x1d3   :  { %3759 = vmatprep.mubr.bf16.mxu1 %v2000_v7 }
 0x1d4   :  { %v1614_v9 = vpop.f32.mrb[36].mxu0  ;;  %v4479_v11 = vpop.f32.mrb[68].mxu1 }
 0x1d5   :  { %v1615_v12 = vadd.f32 %v1614_v9, %v4413_v22  ;;  %v1616_v13 = vpop.f32.mrb[37].mxu0  ;;  %v1455_v15 = vpop.f32.mrb[69].mxu1 }
 0x1d6   :  { %v1617_v17 = vpop.f32.mrb[38].mxu0  ;;  %v4482_v16 = vpop.f32.mrb[70].mxu1 }
 0x1d7   :  { %v1618_v18 = vadd.f32 %v1617_v17, %v4415_v26  ;;  %v1619_v21 = vpop.f32.mrb[39].mxu0  ;;  %v1458_v24 = vpop.f32.mrb[71].mxu1 }
 0x1d9   :  { %v2001_v25 = vpack.c.bf16 %v1618_v18, %v1615_v12 }
 0x1db   :  { %3760 = vmatmul.mubr.bf16.gmra.mrb[112].mxu1 %v2001_v25 }
 0x1dc   :  { %v1622_v20 = vpop.f32.mrb[40].mxu0  ;;  %v4485_v29 = vpop.f32.mrb[72].mxu1 }
 0x1dd   :  { %v1623_v31 = vadd.f32 %v1622_v20, %v4417_v28  ;;  %v1624_v33 = vpop.f32.mrb[41].mxu0  ;;  %v1463_v35 = vpop.f32.mrb[73].mxu1 }
 0x1de   :  { %v1625_v37 = vpop.f32.mrb[42].mxu0  ;;  %v4488_v22 = vpop.f32.mrb[74].mxu1 }
 0x1df   :  { %v1626_v41 = vadd.f32 %v1625_v37, %v4419_v32  ;;  %v1627_v42 = vpop.f32.mrb[43].mxu0  ;;  %v1466_v45 = vpop.f32.mrb[75].mxu1 }
 0x1e1   :  { %v2002_v48 = vpack.c.bf16 %v1626_v41, %v1623_v31 }
 0x1e3   :  { %3763 = vmatprep.mubr.bf16.mxu1 %v2002_v48 }
 0x1e4   :  { %v1630_v26 = vpop.f32.mrb[44].mxu0  ;;  %v4491_v49 = vpop.f32.mrb[76].mxu1 }
 0x1e5   :  { %v1631_v51 = vadd.f32 %v1630_v26, %v4421_v34  ;;  %v1632_v54 = vpop.f32.mrb[45].mxu0  ;;  %v1471_v57 = vpop.f32.mrb[77].mxu1 }
 0x1e6   :  { %v1633_v59 = vpop.f32.mrb[46].mxu0  ;;  %v4494_v28 = vpop.f32.mrb[78].mxu1 }
 0x1e7   :  { %v1634_v61 = vadd.f32 %v1633_v59, %v4423_v38  ;;  %v1635_v63 = vpop.f32.mrb[47].mxu0  ;;  %v1474_v3 = vpop.f32.mrb[79].mxu1 }
 0x1e9   :  { %v2003_v5 = vpack.c.bf16 %v1634_v61, %v1631_v51 }
 0x1eb   :  { %3764 = vmatmul.mubr.bf16.gmra.mrb[116].mxu1 %v2003_v5 }
 0x1ec   :  { %v1638_v32 = vpop.f32.mrb[48].mxu0  ;;  %v4497_v6 = vpop.f32.mrb[80].mxu1 }
 0x1ed   :  { %v1639_v7 = vadd.f32 %v1638_v32, %v4425_v40  ;;  %v1640_v9 = vpop.f32.mrb[49].mxu0  ;;  %v1479_v12 = vpop.f32.mrb[81].mxu1 }
 0x1ee   :  { %v1641_v13 = vpop.f32.mrb[50].mxu0  ;;  %v4500_v34 = vpop.f32.mrb[82].mxu1 }
 0x1ef   :  { %v1642_v15 = vadd.f32 %v1641_v13, %v4427_v44  ;;  %v1643_v17 = vpop.f32.mrb[51].mxu0  ;;  %v1482_v18 = vpop.f32.mrb[83].mxu1 }
 0x1f1   :  { %v2004_v21 = vpack.c.bf16 %v1642_v15, %v1639_v7 }
 0x1f3   :  { %3767 = vmatprep.mubr.bf16.mxu1 %v2004_v21 }
 0x1f4   :  { %v1646_v38 = vpop.f32.mrb[52].mxu0  ;;  %v4503_v24 = vpop.f32.mrb[84].mxu1 }
 0x1f5   :  { %v1647_v25 = vadd.f32 %v1646_v38, %v4429_v46  ;;  %v1648_v20 = vpop.f32.mrb[53].mxu0  ;;  %v1487_v31 = vpop.f32.mrb[85].mxu1 }
 0x1f6   :  { %v1649_v33 = vpop.f32.mrb[54].mxu0  ;;  %v4506_v40 = vpop.f32.mrb[86].mxu1 }
 0x1f7   :  { %v1650_v35 = vadd.f32 %v1649_v33, %v4431_v50  ;;  %v1651_v37 = vpop.f32.mrb[55].mxu0  ;;  %v1490_v41 = vpop.f32.mrb[87].mxu1 }
 0x1f9   :  { %v2005_v42 = vpack.c.bf16 %v1650_v35, %v1647_v25 }
 0x1fb   :  { %3768 = vmatmul.mubr.bf16.gmra.mrb[120].mxu1 %v2005_v42 }
 0x1fc   :  { %v1654_v44 = vpop.f32.mrb[56].mxu0  ;;  %v4509_v45 = vpop.f32.mrb[88].mxu1 }
 0x1fd   :  { %v1655_v48 = vadd.f32 %v1654_v44, %v4433_v52  ;;  %v1656_v26 = vpop.f32.mrb[57].mxu0  ;;  %v1495_v51 = vpop.f32.mrb[89].mxu1 }
 0x1fe   :  { %v1657_v54 = vpop.f32.mrb[58].mxu0  ;;  %v4512_v46 = vpop.f32.mrb[90].mxu1 }
 0x1ff   :  { %v1658_v57 = vadd.f32 %v1657_v54, %v4435_v56  ;;  %v1659_v59 = vpop.f32.mrb[59].mxu0  ;;  %v1498_v61 = vpop.f32.mrb[91].mxu1 }
 0x201   :  { %v2006_v63 = vpack.c.bf16 %v1658_v57, %v1655_v48 }
 0x203   :  { %3771 = vmatprep.mubr.bf16.mxu1 %v2006_v63 }
 0x204   :  { %v1662_v50 = vpop.f32.mrb[60].mxu0  ;;  %v4515_v3 = vpop.f32.mrb[92].mxu1 }
 0x205   :  { %v1663_v5 = vadd.f32 %v1662_v50, %v4437_v58  ;;  %v1664_v32 = vpop.f32.mrb[61].mxu0  ;;  %v1503_v7 = vpop.f32.mrb[93].mxu1 }
 0x206   :  { %v1665_v9 = vpop.f32.mrb[62].mxu0  ;;  %v4518_v52 = vpop.f32.mrb[94].mxu1 }
 0x207   :  { %v1666_v12 = vadd.f32 %v1665_v9, %v4439_v62  ;;  %v1667_v13 = vpop.f32.mrb[63].mxu0  ;;  %v1506_v15 = vpop.f32.mrb[95].mxu1 }
 0x209   :  { %v2007_v17 = vpack.c.bf16 %v1666_v12, %v1663_v5 }
 0x20b   :  { %3772 = vmatmul.mubr.bf16.gmra.mrb[124].mxu1 %v2007_v17 }
 0x20c   :  { %v1670_v56 = vpop.f32.mrb[64].mxu0 }
 0x20d   :  { %v1671_v18 = vadd.f32 %v1670_v56, %v4441_v2  ;;  %v1672_v21 = vpop.f32.mrb[65].mxu0 }
 0x20e   :  { %v1673_v38 = vpop.f32.mrb[66].mxu0 }
 0x20f   :  { %v1674_v25 = vadd.f32 %v1673_v38, %v4443_v8  ;;  %v1675_v20 = vpop.f32.mrb[67].mxu0 }
 0x211   :  { %v2008_v58 = vpack.c.bf16 %v1674_v25, %v1671_v18 }
 0x213   :  { %3775 = vmatprep.mubr.bf16.mxu1 %v2008_v58 }
 0x214   :  { %v1678_v31 = vpop.f32.mrb[68].mxu0 }
 0x215   :  { %v1679_v33 = vadd.f32 %v1678_v31, %v4445_v0  ;;  %v1680_v35 = vpop.f32.mrb[69].mxu0 }
 0x216   :  { %v1681_v37 = vpop.f32.mrb[70].mxu0 }
 0x217   :  { %v1682_v62 = vadd.f32 %v1681_v37, %v4447_v19  ;;  %v1683_v41 = vpop.f32.mrb[71].mxu0 }
 0x219   :  { %v2009_v42 = vpack.c.bf16 %v1682_v62, %v1679_v33 }
 0x21b   :  { %3776 = vmatmul.mubr.bf16.gmra.mrb[128].mxu1 %v2009_v42 }
 0x21c   :  { %v1686_v44 = vpop.f32.mrb[72].mxu0 }
 0x21d   :  { %v1687_v2 = vadd.f32 %v1686_v44, %v4449_v27  ;;  %v1688_v48 = vpop.f32.mrb[73].mxu0 }
 0x21e   :  { %v1689_v26 = vpop.f32.mrb[74].mxu0 }
 0x21f   :  { %v1690_v8 = vadd.f32 %v1689_v26, %v4451_v36  ;;  %v1691_v51 = vpop.f32.mrb[75].mxu0 }
 0x221   :  { %v2010_v54 = vpack.c.bf16 %v1690_v8, %v1687_v2 }
 0x223   :  { %3779 = vmatprep.mubr.bf16.mxu1 %v2010_v54 }
 0x224   :  { %v1694_v57 = vpop.f32.mrb[76].mxu0 }
 0x225   :  { %v1695_v0 = vadd.f32 %v1694_v57, %v4453_v43  ;;  %v1696_v59 = vpop.f32.mrb[77].mxu0 }
 0x226   :  { %v1697_v61 = vpop.f32.mrb[78].mxu0 }
 0x227   :  { %v1698_v19 = vadd.f32 %v1697_v61, %v4455_v53  ;;  %v1699_v63 = vpop.f32.mrb[79].mxu0 }
 0x229   :  { %v2011_v50 = vpack.c.bf16 %v1698_v19, %v1695_v0 }
 0x22b   :  { %3780 = vmatmul.mubr.bf16.gmra.mrb[132].mxu1 %v2011_v50 }
 0x22c   :  { %v1702_v5 = vpop.f32.mrb[80].mxu0 }
 0x22d   :  { %v1703_v27 = vadd.f32 %v1702_v5, %v4457_v60  ;;  %v1704_v32 = vpop.f32.mrb[81].mxu0 }
 0x22e   :  { %v1705_v7 = vpop.f32.mrb[82].mxu0 }
 0x22f   :  { %v1706_v36 = vadd.f32 %v1705_v7, %v4459_v4  ;;  %v1707_v9 = vpop.f32.mrb[83].mxu0 }
 0x231   :  { %v2012_v12 = vpack.c.bf16 %v1706_v36, %v1703_v27 }
 0x233   :  { %3783 = vmatprep.mubr.bf16.mxu1 %v2012_v12 }
 0x234   :  { %v1710_v13 = vpop.f32.mrb[84].mxu0 }
 0x235   :  { %v1711_v43 = vadd.f32 %v1710_v13, %v4461_v10  ;;  %v1712_v15 = vpop.f32.mrb[85].mxu0 }
 0x236   :  { %v1713_v17 = vpop.f32.mrb[86].mxu0 }
 0x237   :  { %v1714_v53 = vadd.f32 %v1713_v17, %v4463_v14  ;;  %v1715_v56 = vpop.f32.mrb[87].mxu0 }
 0x239   :  { %v2013_v18 = vpack.c.bf16 %v1714_v53, %v1711_v43 }
 0x23b   :  { %3784 = vmatmul.mubr.bf16.gmra.mrb[136].mxu1 %v2013_v18 }
 0x23c   :  { %v1718_v21 = vpop.f32.mrb[88].mxu0 }
 0x23d   :  { %v1719_v60 = vadd.f32 %v1718_v21, %v4465_v23  ;;  %v1720_v38 = vpop.f32.mrb[89].mxu0 }
 0x23e   :  { %v1721_v25 = vpop.f32.mrb[90].mxu0 }
 0x23f   :  { %v1722_v4 = vadd.f32 %v1721_v25, %v4467_v30  ;;  %v1723_v20 = vpop.f32.mrb[91].mxu0 }
 0x241   :  { %v2014_v58 = vpack.c.bf16 %v1722_v4, %v1719_v60 }
 0x243   :  { %3787 = vmatprep.mubr.bf16.mxu1 %v2014_v58 }
 0x244   :  { %v1726_v31 = vpop.f32.mrb[92].mxu0 }
 0x245   :  { %v1727_v10 = vadd.f32 %v1726_v31, %v4469_v39  ;;  %v1728_v33 = vpop.f32.mrb[93].mxu0 }
 0x246   :  { %v1729_v35 = vpop.f32.mrb[94].mxu0 }
 0x247   :  { %v1730_v14 = vadd.f32 %v1729_v35, %v4471_v47  ;;  %v1731_v37 = vpop.f32.mrb[95].mxu0 }
 0x249   :  { %v2015_v62 = vpack.c.bf16 %v1730_v14, %v1727_v10 }
 0x24b   :  { %3788 = vmatmul.mubr.bf16.gmra.mrb[140].mxu1 %v2015_v62 }
 0x24c   :  { %v1734_v41 = vpop.f32.mrb[96].mxu0 }
 0x24d   :  { %v1735_v23 = vadd.f32 %v1734_v41, %v4473_v55  ;;  %v1736_v42 = vpop.f32.mrb[97].mxu0 }
 0x24e   :  { %v1737_v44 = vpop.f32.mrb[98].mxu0 }
 0x24f   :  { %v1738_v30 = vadd.f32 %v1737_v44, %v4476_v1  ;;  %v1739_v2 = vpop.f32.mrb[99].mxu0 }
 0x251   :  { %v2016_v48 = vpack.c.bf16 %v1738_v30, %v1735_v23 }
 0x253   :  { %3791 = vmatprep.mubr.bf16.mxu1 %v2016_v48 }
 0x254   :  { %v1742_v26 = vpop.f32.mrb[100].mxu0 }
 0x255   :  { %v1743_v39 = vadd.f32 %v1742_v26, %v4479_v11  ;;  %v1744_v8 = vpop.f32.mrb[101].mxu0 }
 0x256   :  { %v1745_v51 = vpop.f32.mrb[102].mxu0 }
 0x257   :  { %v1746_v47 = vadd.f32 %v1745_v51, %v4482_v16  ;;  %v1747_v54 = vpop.f32.mrb[103].mxu0 }
 0x259   :  { %v2017_v57 = vpack.c.bf16 %v1746_v47, %v1743_v39 }
 0x25b   :  { %3792 = vmatmul.mubr.bf16.gmra.mrb[144].mxu1 %v2017_v57 }
 0x25c   :  { %v1750_v0 = vpop.f32.mrb[104].mxu0 }
 0x25d   :  { %v1751_v55 = vadd.f32 %v1750_v0, %v4485_v29  ;;  %v1752_v59 = vpop.f32.mrb[105].mxu0  ;;  %v4548_v29 = vld [vmem:[%s4652_s3] ss:$0 sm:$0xff]  ;;  %s4287_s3 = smov [#allocation9]  }
 0x25e   :  { %v1753_v61 = vpop.f32.mrb[106].mxu0  ;;  %s3172_s9 = sshll.u32 %s4287_s3, 4  ;;  %s3173_s9 = int_to_ptr.vmem [resolvable:$true] %s3172_s9 }
 0x25f   :  { %v1754_v1 = vadd.f32 %v1753_v61, %v4488_v22  ;;  %v1755_v19 = vpop.f32.mrb[107].mxu0  ;;  %s4227_s10 = scalar_lea.vmem %s3173_s9, 4096  ;;  %p4232_p11 = scmp.lt.s32.totalorder %s3173_s9, %s3173_s9 }
 0x260   :  { %p4228_p10 = scmp.ne.s32.totalorder %s3173_s9, %s4227_s10  ;;  %p4233_p12 = scmp.lt.s32.totalorder %s4227_s10, %s4227_s10 }
 0x261   :  { %v2018_v63 = vpack.c.bf16 %v1754_v1, %v1751_v55 }
 0x262   :  { %p4234_p13 = por %p4233_p12, %p4232_p11 }
 0x263   :  { %3795 = vmatprep.mubr.bf16.mxu1 %v2018_v63 }
 0x264   :  { %v1758_v50 = vpop.f32.mrb[108].mxu0  ;;  %p4235_p0 = pnand %p4234_p13, %p4228_p10 }
 0x265   :  { %v1759_v11 = vadd.f32 %v1758_v50, %v4491_v49  ;;  %v1760_v5 = vpop.f32.mrb[109].mxu0 }
 0x266   :  { %v1761_v27 = vpop.f32.mrb[110].mxu0 }
 0x267   :  { %v1762_v16 = vadd.f32 %v1761_v27, %v4494_v28  ;;  %v1763_v32 = vpop.f32.mrb[111].mxu0 }
 0x269   :  { %v2019_v7 = vpack.c.bf16 %v1762_v16, %v1759_v11 }
 0x26b   :  { %3796 = vmatmul.mubr.bf16.gmra.mrb[148].mxu1 %v2019_v7 }
 0x26c   :  { %v1766_v36 = vpop.f32.mrb[112].mxu0  ;;  %v3745_v22 = vpop.f32.mrb[96].mxu1 }
 0x26d   :  { %v1767_v9 = vadd.f32 %v1766_v36, %v4497_v6  ;;  %v1768_v12 = vpop.f32.mrb[113].mxu0  ;;  %v2129_v13 = vpop.f32.mrb[97].mxu1  ;;  %v2138_v28 = vadd.f32 %v3745_v22, %v4548_v29 }
 0x26e   :  { %v2130_v49 = vadd.f32 %v4548_v29, %v2129_v13  ;;  %v1769_v43 = vpop.f32.mrb[114].mxu0  ;;  %v3746_v15 = vpop.f32.mrb[98].mxu1 }
 0x26f   :  { %v1770_v17 = vadd.f32 %v1769_v43, %v4500_v34  ;;  %v2141_v53 = vadd.f32 %v3746_v15, %v4548_v29  ;;  %v1771_v56 = vpop.f32.mrb[115].mxu0  ;;  %v2132_v18 = vpop.f32.mrb[99].mxu1  ;;  %v3035_v58 = vmul.f32 %v2138_v28, %v2138_v28 }
 0x270   :  { %v2133_v21 = vadd.f32 %v4548_v29, %v2132_v18  ;;  %v3033_v25 = vmul.f32 %v2130_v49, %v2130_v49 }
 0x271   :  { %v2020_v60 = vpack.c.bf16 %v1770_v17, %v1767_v9  ;;  %v3504_v38 = vpack.c.bf16 %v2141_v53, %v2138_v28  ;;  %v3036_v14 = vmul.f32 %v2141_v53, %v2141_v53 }
 0x272   :  { %v3499_v6 = vpack.c.bf16 %v2133_v21, %v2130_v49  ;;  %v2963_v4 = vadd.f32 %v2133_v21, %v2130_v49  ;;  %v3034_v20 = vmul.f32 %v2133_v21, %v2133_v21 }
 0x273   :  { %3656 = vst [vmem:[#allocation9 + $0x8] sm:$0xff] %v3504_v38   ;;  %3799 = vmatprep.mubr.bf16.mxu1 %v2020_v60 }
 0x274   :  { %3500 = vst [vmem:[#allocation9] sm:$0xff] %v3499_v6   ;;  %v2964_v31 = vadd.f32 %v2963_v4, %v2138_v28  ;;  %v3097_v10 = vadd.f32 %v3034_v20, %v3033_v25  ;;  %v1774_v33 = vpop.f32.mrb[116].mxu0 }
 0x275   :  { %v1775_v34 = vadd.f32 %v1774_v33, %v4503_v24  ;;  %v1776_v35 = vpop.f32.mrb[117].mxu0 }
 0x276   :  { %v3098_v37 = vadd.f32 %v3097_v10, %v3035_v58  ;;  %v1777_v62 = vpop.f32.mrb[118].mxu0  ;;  %v2965_v41 = vadd.f32 %v2964_v31, %v2141_v53 }
 0x277   :  { %v1778_v23 = vadd.f32 %v1777_v62, %v4506_v40  ;;  %v1779_v42 = vpop.f32.mrb[119].mxu0 }
 0x278   :  { %v3099_v44 = vadd.f32 %v3098_v37, %v3036_v14 }
 0x279   :  { %v2021_v30 = vpack.c.bf16 %v1778_v23, %v1775_v34 }
 0x27b   :  { %3800 = vmatmul.mubr.bf16.gmra.mrb[152].mxu1 %v2021_v30 }
 0x27c   :  { %v1782_v2 = vpop.f32.mrb[120].mxu0  ;;  %v3749_v48 = vpop.f32.mrb[100].mxu1 }
 0x27d   :  { %v1783_v26 = vadd.f32 %v1782_v2, %v4509_v45  ;;  %v1784_v39 = vpop.f32.mrb[121].mxu0  ;;  %v2145_v8 = vpop.f32.mrb[101].mxu1  ;;  %v2154_v54 = vadd.f32 %v3749_v48, %v4548_v29 }
 0x27e   :  { %v2146_v51 = vadd.f32 %v4548_v29, %v2145_v8  ;;  %v1785_v24 = vpop.f32.mrb[122].mxu0  ;;  %v3750_v47 = vpop.f32.mrb[102].mxu1 }
 0x27f   :  { %v1786_v57 = vadd.f32 %v1785_v24, %v4512_v46  ;;  %v2157_v40 = vadd.f32 %v3750_v47, %v4548_v29  ;;  %v1787_v0 = vpop.f32.mrb[123].mxu0  ;;  %v2148_v55 = vpop.f32.mrb[103].mxu1  ;;  %v3039_v27 = vmul.f32 %v2154_v54, %v2154_v54 }
 0x280   :  { %v2966_v59 = vadd.f32 %v2965_v41, %v2146_v51  ;;  %v3037_v61 = vmul.f32 %v2146_v51, %v2146_v51  ;;  %v2149_v1 = vadd.f32 %v4548_v29, %v2148_v55 }
 0x281   :  { %v2022_v19 = vpack.c.bf16 %v1786_v57, %v1783_v26  ;;  %v3514_v45 = vpack.c.bf16 %v2157_v40, %v2154_v54  ;;  %v3040_v22 = vmul.f32 %v2157_v40, %v2157_v40 }
 0x282   :  { %v3100_v63 = vadd.f32 %v3099_v44, %v3037_v61  ;;  %v3509_v50 = vpack.c.bf16 %v2149_v1, %v2146_v51  ;;  %v2967_v11 = vadd.f32 %v2966_v59, %v2149_v1  ;;  %v3038_v5 = vmul.f32 %v2149_v1, %v2149_v1 }
 0x283   :  { %3658 = vst [vmem:[#allocation9 + $0x18] sm:$0xff] %v3514_v45   ;;  %3803 = vmatprep.mubr.bf16.mxu1 %v2022_v19 }
 0x284   :  { %3657 = vst [vmem:[#allocation9 + $0x10] sm:$0xff] %v3509_v50   ;;  %v2968_v16 = vadd.f32 %v2967_v11, %v2154_v54  ;;  %v3101_v46 = vadd.f32 %v3100_v63, %v3038_v5  ;;  %v1790_v32 = vpop.f32.mrb[124].mxu0 }
 0x285   :  { %v1791_v7 = vadd.f32 %v1790_v32, %v4515_v3  ;;  %v1792_v36 = vpop.f32.mrb[125].mxu0 }
 0x286   :  { %v3102_v9 = vadd.f32 %v3101_v46, %v3039_v27  ;;  %v1793_v12 = vpop.f32.mrb[126].mxu0  ;;  %v2969_v13 = vadd.f32 %v2968_v16, %v2157_v40 }
 0x287   :  { %v1794_v49 = vadd.f32 %v1793_v12, %v4518_v52  ;;  %v1795_v43 = vpop.f32.mrb[127].mxu0 }
 0x288   :  { %v3103_v15 = vadd.f32 %v3102_v9, %v3040_v22 }
 0x289   :  { %v2023_v28 = vpack.c.bf16 %v1794_v49, %v1791_v7 }
 0x28b   :  { %3804 = vmatmul.mubr.bf16.gmra.mrb[156].mxu1 %v2023_v28 }
 0x28c   :  { %v3753_v17 = vpop.f32.mrb[104].mxu1 }
 0x28d   :  { %v2161_v53 = vpop.f32.mrb[105].mxu1  ;;  %v2170_v21 = vadd.f32 %v3753_v17, %v4548_v29 }
 0x28e   :  { %v2162_v56 = vadd.f32 %v4548_v29, %v2161_v53  ;;  %v3754_v18 = vpop.f32.mrb[106].mxu1 }
 0x28f   :  { %v2173_v3 = vadd.f32 %v3754_v18, %v4548_v29  ;;  %v2164_v60 = vpop.f32.mrb[107].mxu1  ;;  %v3043_v10 = vmul.f32 %v2170_v21, %v2170_v21 }
 0x290   :  { %v2970_v38 = vadd.f32 %v2969_v13, %v2162_v56  ;;  %v3041_v25 = vmul.f32 %v2162_v56, %v2162_v56  ;;  %v2165_v6 = vadd.f32 %v4548_v29, %v2164_v60 }
 0x291   :  { %v3524_v4 = vpack.c.bf16 %v2173_v3, %v2170_v21  ;;  %v3044_v35 = vmul.f32 %v2173_v3, %v2173_v3 }
 0x292   :  { %v3104_v52 = vadd.f32 %v3103_v15, %v3041_v25  ;;  %v3519_v20 = vpack.c.bf16 %v2165_v6, %v2162_v56  ;;  %v2971_v58 = vadd.f32 %v2970_v38, %v2165_v6  ;;  %v3042_v31 = vmul.f32 %v2165_v6, %v2165_v6 }
 0x293   :  { %3660 = vst [vmem:[#allocation9 + $0x28] sm:$0xff] %v3524_v4  }
 0x294   :  { %3659 = vst [vmem:[#allocation9 + $0x20] sm:$0xff] %v3519_v20   ;;  %v2972_v33 = vadd.f32 %v2971_v58, %v2170_v21  ;;  %v3105_v34 = vadd.f32 %v3104_v52, %v3042_v31 }
 0x296   :  { %v3106_v14 = vadd.f32 %v3105_v34, %v3043_v10  ;;  %v2973_v37 = vadd.f32 %v2972_v33, %v2173_v3 }
 0x298   :  { %v3107_v62 = vadd.f32 %v3106_v14, %v3044_v35 }
 0x29c   :  { %v3757_v41 = vpop.f32.mrb[108].mxu1 }
 0x29d   :  { %v2177_v23 = vpop.f32.mrb[109].mxu1  ;;  %v2186_v30 = vadd.f32 %v3757_v41, %v4548_v29 }
 0x29e   :  { %v2178_v42 = vadd.f32 %v4548_v29, %v2177_v23  ;;  %v3758_v44 = vpop.f32.mrb[110].mxu1 }
 0x29f   :  { %v2189_v2 = vadd.f32 %v3758_v44, %v4548_v29  ;;  %v2180_v48 = vpop.f32.mrb[111].mxu1  ;;  %v3047_v40 = vmul.f32 %v2186_v30, %v2186_v30 }
 0x2a0   :  { %v2974_v26 = vadd.f32 %v2973_v37, %v2178_v42  ;;  %v3045_v39 = vmul.f32 %v2178_v42, %v2178_v42  ;;  %v2181_v8 = vadd.f32 %v4548_v29, %v2180_v48 }
 0x2a1   :  { %v3534_v51 = vpack.c.bf16 %v2189_v2, %v2186_v30  ;;  %v3048_v59 = vmul.f32 %v2189_v2, %v2189_v2 }
 0x2a2   :  { %v3108_v24 = vadd.f32 %v3107_v62, %v3045_v39  ;;  %v3529_v47 = vpack.c.bf16 %v2181_v8, %v2178_v42  ;;  %v2975_v54 = vadd.f32 %v2974_v26, %v2181_v8  ;;  %v3046_v57 = vmul.f32 %v2181_v8, %v2181_v8 }
 0x2a3   :  { %3662 = vst [vmem:[#allocation9 + $0x38] sm:$0xff] %v3534_v51  }
 0x2a4   :  { %3661 = vst [vmem:[#allocation9 + $0x30] sm:$0xff] %v3529_v47   ;;  %v2976_v0 = vadd.f32 %v2975_v54, %v2186_v30  ;;  %v3109_v55 = vadd.f32 %v3108_v24, %v3046_v57 }
 0x2a6   :  { %v3110_v61 = vadd.f32 %v3109_v55, %v3047_v40  ;;  %v2977_v1 = vadd.f32 %v2976_v0, %v2189_v2 }
 0x2a8   :  { %v3111_v19 = vadd.f32 %v3110_v61, %v3048_v59 }
 0x2ae   :  { %v3761_v45 = vpop.f32.mrb[112].mxu1 }
 0x2af   :  { %v2193_v63 = vpop.f32.mrb[113].mxu1  ;;  %v2202_v5 = vadd.f32 %v3761_v45, %v4548_v29 }
 0x2b0   :  { %v2194_v50 = vadd.f32 %v4548_v29, %v2193_v63  ;;  %v3762_v11 = vpop.f32.mrb[114].mxu1 }
 0x2b1   :  { %v2205_v27 = vadd.f32 %v3762_v11, %v4548_v29  ;;  %v2196_v16 = vpop.f32.mrb[115].mxu1  ;;  %v3051_v49 = vmul.f32 %v2202_v5, %v2202_v5 }
 0x2b2   :  { %v2978_v46 = vadd.f32 %v2977_v1, %v2194_v50  ;;  %v3049_v32 = vmul.f32 %v2194_v50, %v2194_v50  ;;  %v2197_v7 = vadd.f32 %v4548_v29, %v2196_v16 }
 0x2b3   :  { %v3544_v36 = vpack.c.bf16 %v2205_v27, %v2202_v5  ;;  %v3052_v28 = vmul.f32 %v2205_v27, %v2205_v27 }
 0x2b4   :  { %v3112_v22 = vadd.f32 %v3111_v19, %v3049_v32  ;;  %v3539_v9 = vpack.c.bf16 %v2197_v7, %v2194_v50  ;;  %v2979_v12 = vadd.f32 %v2978_v46, %v2197_v7  ;;  %v3050_v13 = vmul.f32 %v2197_v7, %v2197_v7 }
 0x2b5   :  { %3664 = vst [vmem:[#allocation9 + $0x48] sm:$0xff] %v3544_v36  }
 0x2b6   :  { %3663 = vst [vmem:[#allocation9 + $0x40] sm:$0xff] %v3539_v9   ;;  %v2980_v43 = vadd.f32 %v2979_v12, %v2202_v5  ;;  %v3113_v15 = vadd.f32 %v3112_v22, %v3050_v13 }
 0x2b8   :  { %v3114_v17 = vadd.f32 %v3113_v15, %v3051_v49  ;;  %v2981_v53 = vadd.f32 %v2980_v43, %v2205_v27 }
 0x2ba   :  { %v3115_v56 = vadd.f32 %v3114_v17, %v3052_v28 }
 0x2be   :  { %v3765_v18 = vpop.f32.mrb[116].mxu1 }
 0x2bf   :  { %v2209_v21 = vpop.f32.mrb[117].mxu1  ;;  %v2218_v38 = vadd.f32 %v3765_v18, %v4548_v29 }
 0x2c0   :  { %v2210_v3 = vadd.f32 %v4548_v29, %v2209_v21  ;;  %v3766_v60 = vpop.f32.mrb[118].mxu1 }
 0x2c1   :  { %v2221_v25 = vadd.f32 %v3766_v60, %v4548_v29  ;;  %v2212_v6 = vpop.f32.mrb[119].mxu1  ;;  %v3055_v35 = vmul.f32 %v2218_v38, %v2218_v38 }
 0x2c2   :  { %v2982_v4 = vadd.f32 %v2981_v53, %v2210_v3  ;;  %v3053_v52 = vmul.f32 %v2210_v3, %v2210_v3  ;;  %v2213_v20 = vadd.f32 %v4548_v29, %v2212_v6 }
 0x2c3   :  { %v3554_v58 = vpack.c.bf16 %v2221_v25, %v2218_v38  ;;  %v3056_v62 = vmul.f32 %v2221_v25, %v2221_v25 }
 0x2c4   :  { %v3116_v31 = vadd.f32 %v3115_v56, %v3053_v52  ;;  %v3549_v10 = vpack.c.bf16 %v2213_v20, %v2210_v3  ;;  %v2983_v33 = vadd.f32 %v2982_v4, %v2213_v20  ;;  %v3054_v34 = vmul.f32 %v2213_v20, %v2213_v20 }
 0x2c5   :  { %3666 = vst [vmem:[#allocation9 + $0x58] sm:$0xff] %v3554_v58  }
 0x2c6   :  { %3665 = vst [vmem:[#allocation9 + $0x50] sm:$0xff] %v3549_v10   ;;  %v2984_v14 = vadd.f32 %v2983_v33, %v2218_v38  ;;  %v3117_v37 = vadd.f32 %v3116_v31, %v3054_v34 }
 0x2c8   :  { %v3118_v41 = vadd.f32 %v3117_v37, %v3055_v35  ;;  %v2985_v23 = vadd.f32 %v2984_v14, %v2221_v25 }
 0x2ca   :  { %v3119_v42 = vadd.f32 %v3118_v41, %v3056_v62 }
 0x2ce   :  { %v3769_v44 = vpop.f32.mrb[120].mxu1 }
 0x2cf   :  { %v2225_v30 = vpop.f32.mrb[121].mxu1  ;;  %v2234_v26 = vadd.f32 %v3769_v44, %v4548_v29 }
 0x2d0   :  { %v2226_v2 = vadd.f32 %v4548_v29, %v2225_v30  ;;  %v3770_v48 = vpop.f32.mrb[122].mxu1 }
 0x2d1   :  { %v2237_v39 = vadd.f32 %v3770_v48, %v4548_v29  ;;  %v2228_v8 = vpop.f32.mrb[123].mxu1  ;;  %v3059_v59 = vmul.f32 %v2234_v26, %v2234_v26 }
 0x2d2   :  { %v2986_v51 = vadd.f32 %v2985_v23, %v2226_v2  ;;  %v3057_v24 = vmul.f32 %v2226_v2, %v2226_v2  ;;  %v2229_v47 = vadd.f32 %v4548_v29, %v2228_v8 }
 0x2d3   :  { %v3564_v54 = vpack.c.bf16 %v2237_v39, %v2234_v26  ;;  %v3060_v19 = vmul.f32 %v2237_v39, %v2237_v39 }
 0x2d4   :  { %v3120_v57 = vadd.f32 %v3119_v42, %v3057_v24  ;;  %v3559_v40 = vpack.c.bf16 %v2229_v47, %v2226_v2  ;;  %v2987_v0 = vadd.f32 %v2986_v51, %v2229_v47  ;;  %v3058_v55 = vmul.f32 %v2229_v47, %v2229_v47 }
 0x2d5   :  { %3668 = vst [vmem:[#allocation9 + $0x68] sm:$0xff] %v3564_v54  }
 0x2d6   :  { %3667 = vst [vmem:[#allocation9 + $0x60] sm:$0xff] %v3559_v40   ;;  %v2988_v61 = vadd.f32 %v2987_v0, %v2234_v26  ;;  %v3121_v1 = vadd.f32 %v3120_v57, %v3058_v55 }
 0x2d8   :  { %v3122_v45 = vadd.f32 %v3121_v1, %v3059_v59  ;;  %v2989_v63 = vadd.f32 %v2988_v61, %v2237_v39 }
 0x2da   :  { %v3123_v50 = vadd.f32 %v3122_v45, %v3060_v19 }
 0x2de   :  { %v3773_v11 = vpop.f32.mrb[124].mxu1 }
 0x2df   :  { %v2241_v5 = vpop.f32.mrb[125].mxu1  ;;  %v2250_v46 = vadd.f32 %v3773_v11, %v4548_v29 }
 0x2e0   :  { %v2242_v27 = vadd.f32 %v4548_v29, %v2241_v5  ;;  %v3774_v16 = vpop.f32.mrb[126].mxu1 }
 0x2e1   :  { %v2253_v32 = vadd.f32 %v3774_v16, %v4548_v29  ;;  %v2244_v7 = vpop.f32.mrb[127].mxu1  ;;  %v3063_v28 = vmul.f32 %v2250_v46, %v2250_v46 }
 0x2e2   :  { %v2990_v36 = vadd.f32 %v2989_v63, %v2242_v27  ;;  %v3061_v22 = vmul.f32 %v2242_v27, %v2242_v27  ;;  %v2245_v9 = vadd.f32 %v4548_v29, %v2244_v7 }
 0x2e3   :  { %v3574_v12 = vpack.c.bf16 %v2253_v32, %v2250_v46  ;;  %v3064_v56 = vmul.f32 %v2253_v32, %v2253_v32 }
 0x2e4   :  { %v3124_v13 = vadd.f32 %v3123_v50, %v3061_v22  ;;  %v3569_v49 = vpack.c.bf16 %v2245_v9, %v2242_v27  ;;  %v2991_v43 = vadd.f32 %v2990_v36, %v2245_v9  ;;  %v3062_v15 = vmul.f32 %v2245_v9, %v2245_v9 }
 0x2e5   :  { %3670 = vst [vmem:[#allocation9 + $0x78] sm:$0xff] %v3574_v12  }
 0x2e6   :  { %3669 = vst [vmem:[#allocation9 + $0x70] sm:$0xff] %v3569_v49   ;;  %v2992_v17 = vadd.f32 %v2991_v43, %v2250_v46  ;;  %v3125_v53 = vadd.f32 %v3124_v13, %v3062_v15 }
 0x2e8   :  { %v3126_v18 = vadd.f32 %v3125_v53, %v3063_v28  ;;  %v2993_v21 = vadd.f32 %v2992_v17, %v2253_v32 }
 0x2ea   :  { %v3127_v3 = vadd.f32 %v3126_v18, %v3064_v56 }
 0x2ee   :  { %v3777_v60 = vpop.f32.mrb[128].mxu1 }
 0x2ef   :  { %v2257_v38 = vpop.f32.mrb[129].mxu1  ;;  %v2266_v4 = vadd.f32 %v3777_v60, %v4548_v29 }
 0x2f0   :  { %v2258_v25 = vadd.f32 %v4548_v29, %v2257_v38  ;;  %v3778_v6 = vpop.f32.mrb[130].mxu1 }
 0x2f1   :  { %v2269_v52 = vadd.f32 %v3778_v6, %v4548_v29  ;;  %v2260_v20 = vpop.f32.mrb[131].mxu1  ;;  %v3067_v62 = vmul.f32 %v2266_v4, %v2266_v4 }
 0x2f2   :  { %v2994_v58 = vadd.f32 %v2993_v21, %v2258_v25  ;;  %v3065_v31 = vmul.f32 %v2258_v25, %v2258_v25  ;;  %v2261_v10 = vadd.f32 %v4548_v29, %v2260_v20 }
 0x2f3   :  { %v3584_v33 = vpack.c.bf16 %v2269_v52, %v2266_v4  ;;  %v3068_v42 = vmul.f32 %v2269_v52, %v2269_v52 }
 0x2f4   :  { %v3128_v34 = vadd.f32 %v3127_v3, %v3065_v31  ;;  %v3579_v35 = vpack.c.bf16 %v2261_v10, %v2258_v25  ;;  %v2995_v14 = vadd.f32 %v2994_v58, %v2261_v10  ;;  %v3066_v37 = vmul.f32 %v2261_v10, %v2261_v10 }
 0x2f5   :  { %3672 = vst [vmem:[#allocation9 + $0x88] sm:$0xff] %v3584_v33  }
 0x2f6   :  { %3671 = vst [vmem:[#allocation9 + $0x80] sm:$0xff] %v3579_v35   ;;  %v2996_v41 = vadd.f32 %v2995_v14, %v2266_v4  ;;  %v3129_v23 = vadd.f32 %v3128_v34, %v3066_v37 }
 0x2f8   :  { %v3130_v44 = vadd.f32 %v3129_v23, %v3067_v62  ;;  %v2997_v30 = vadd.f32 %v2996_v41, %v2269_v52 }
 0x2fa   :  { %v3131_v2 = vadd.f32 %v3130_v44, %v3068_v42 }
 0x2fe   :  { %v3781_v48 = vpop.f32.mrb[132].mxu1 }
 0x2ff   :  { %v2273_v26 = vpop.f32.mrb[133].mxu1  ;;  %v2282_v51 = vadd.f32 %v3781_v48, %v4548_v29 }
 0x300   :  { %v2274_v39 = vadd.f32 %v4548_v29, %v2273_v26  ;;  %v3782_v8 = vpop.f32.mrb[134].mxu1 }
 0x301   :  { %v2285_v24 = vadd.f32 %v3782_v8, %v4548_v29  ;;  %v2276_v47 = vpop.f32.mrb[135].mxu1  ;;  %v3071_v19 = vmul.f32 %v2282_v51, %v2282_v51 }
 0x302   :  { %v2998_v54 = vadd.f32 %v2997_v30, %v2274_v39  ;;  %v3069_v57 = vmul.f32 %v2274_v39, %v2274_v39  ;;  %v2277_v40 = vadd.f32 %v4548_v29, %v2276_v47 }
 0x303   :  { %v3594_v0 = vpack.c.bf16 %v2285_v24, %v2282_v51  ;;  %v3072_v50 = vmul.f32 %v2285_v24, %v2285_v24 }
 0x304   :  { %v3132_v55 = vadd.f32 %v3131_v2, %v3069_v57  ;;  %v3589_v59 = vpack.c.bf16 %v2277_v40, %v2274_v39  ;;  %v2999_v61 = vadd.f32 %v2998_v54, %v2277_v40  ;;  %v3070_v1 = vmul.f32 %v2277_v40, %v2277_v40 }
 0x305   :  { %3674 = vst [vmem:[#allocation9 + $0x98] sm:$0xff] %v3594_v0  }
 0x306   :  { %3673 = vst [vmem:[#allocation9 + $0x90] sm:$0xff] %v3589_v59   ;;  %v3000_v45 = vadd.f32 %v2999_v61, %v2282_v51  ;;  %v3133_v63 = vadd.f32 %v3132_v55, %v3070_v1 }
 0x308   :  { %v3134_v11 = vadd.f32 %v3133_v63, %v3071_v19  ;;  %v3001_v5 = vadd.f32 %v3000_v45, %v2285_v24 }
 0x30a   :  { %v3135_v27 = vadd.f32 %v3134_v11, %v3072_v50 }
 0x30e   :  { %v3785_v16 = vpop.f32.mrb[136].mxu1 }
 0x30f   :  { %v2289_v46 = vpop.f32.mrb[137].mxu1  ;;  %v2298_v36 = vadd.f32 %v3785_v16, %v4548_v29 }
 0x310   :  { %v2290_v32 = vadd.f32 %v4548_v29, %v2289_v46  ;;  %v3786_v7 = vpop.f32.mrb[138].mxu1 }
 0x311   :  { %v2301_v22 = vadd.f32 %v3786_v7, %v4548_v29  ;;  %v2292_v9 = vpop.f32.mrb[139].mxu1  ;;  %v3075_v56 = vmul.f32 %v2298_v36, %v2298_v36 }
 0x312   :  { %v3002_v12 = vadd.f32 %v3001_v5, %v2290_v32  ;;  %v3073_v13 = vmul.f32 %v2290_v32, %v2290_v32  ;;  %v2293_v49 = vadd.f32 %v4548_v29, %v2292_v9 }
 0x313   :  { %v3604_v43 = vpack.c.bf16 %v2301_v22, %v2298_v36  ;;  %v3076_v3 = vmul.f32 %v2301_v22, %v2301_v22 }
 0x314   :  { %v3136_v15 = vadd.f32 %v3135_v27, %v3073_v13  ;;  %v3599_v28 = vpack.c.bf16 %v2293_v49, %v2290_v32  ;;  %v3003_v17 = vadd.f32 %v3002_v12, %v2293_v49  ;;  %v3074_v53 = vmul.f32 %v2293_v49, %v2293_v49 }
 0x315   :  { %3676 = vst [vmem:[#allocation9 + $0xa8] sm:$0xff] %v3604_v43  }
 0x316   :  { %3675 = vst [vmem:[#allocation9 + $0xa0] sm:$0xff] %v3599_v28   ;;  %v3004_v18 = vadd.f32 %v3003_v17, %v2298_v36  ;;  %v3137_v21 = vadd.f32 %v3136_v15, %v3074_v53 }
 0x318   :  { %v3138_v60 = vadd.f32 %v3137_v21, %v3075_v56  ;;  %v3005_v38 = vadd.f32 %v3004_v18, %v2301_v22 }
 0x31a   :  { %v3139_v25 = vadd.f32 %v3138_v60, %v3076_v3 }
 0x31e   :  { %v3789_v6 = vpop.f32.mrb[140].mxu1 }
 0x31f   :  { %v2305_v4 = vpop.f32.mrb[141].mxu1  ;;  %v2314_v58 = vadd.f32 %v3789_v6, %v4548_v29 }
 0x320   :  { %v2306_v52 = vadd.f32 %v4548_v29, %v2305_v4  ;;  %v3790_v20 = vpop.f32.mrb[142].mxu1 }
 0x321   :  { %v2317_v31 = vadd.f32 %v3790_v20, %v4548_v29  ;;  %v2308_v10 = vpop.f32.mrb[143].mxu1  ;;  %v3079_v42 = vmul.f32 %v2314_v58, %v2314_v58 }
 0x322   :  { %v3006_v33 = vadd.f32 %v3005_v38, %v2306_v52  ;;  %v3077_v34 = vmul.f32 %v2306_v52, %v2306_v52  ;;  %v2309_v35 = vadd.f32 %v4548_v29, %v2308_v10 }
 0x323   :  { %v3614_v14 = vpack.c.bf16 %v2317_v31, %v2314_v58  ;;  %v3080_v2 = vmul.f32 %v2317_v31, %v2317_v31 }
 0x324   :  { %v3140_v37 = vadd.f32 %v3139_v25, %v3077_v34  ;;  %v3609_v62 = vpack.c.bf16 %v2309_v35, %v2306_v52  ;;  %v3007_v41 = vadd.f32 %v3006_v33, %v2309_v35  ;;  %v3078_v23 = vmul.f32 %v2309_v35, %v2309_v35 }
 0x325   :  { %3678 = vst [vmem:[#allocation9 + $0xb8] sm:$0xff] %v3614_v14  }
 0x326   :  { %3677 = vst [vmem:[#allocation9 + $0xb0] sm:$0xff] %v3609_v62   ;;  %v3008_v44 = vadd.f32 %v3007_v41, %v2314_v58  ;;  %v3141_v30 = vadd.f32 %v3140_v37, %v3078_v23 }
 0x328   :  { %v3142_v48 = vadd.f32 %v3141_v30, %v3079_v42  ;;  %v3009_v26 = vadd.f32 %v3008_v44, %v2317_v31 }
 0x32a   :  { %v3143_v39 = vadd.f32 %v3142_v48, %v3080_v2 }
 0x32e   :  { %v3793_v8 = vpop.f32.mrb[144].mxu1 }
 0x32f   :  { %v2321_v51 = vpop.f32.mrb[145].mxu1  ;;  %v2330_v54 = vadd.f32 %v3793_v8, %v4548_v29 }
 0x330   :  { %v2322_v24 = vadd.f32 %v4548_v29, %v2321_v51  ;;  %v3794_v47 = vpop.f32.mrb[146].mxu1 }
 0x331   :  { %v2333_v57 = vadd.f32 %v3794_v47, %v4548_v29  ;;  %v2324_v40 = vpop.f32.mrb[147].mxu1  ;;  %v3083_v50 = vmul.f32 %v2330_v54, %v2330_v54 }
 0x332   :  { %v3010_v0 = vadd.f32 %v3009_v26, %v2322_v24  ;;  %v3081_v55 = vmul.f32 %v2322_v24, %v2322_v24  ;;  %v2325_v59 = vadd.f32 %v4548_v29, %v2324_v40 }
 0x333   :  { %v3624_v61 = vpack.c.bf16 %v2333_v57, %v2330_v54  ;;  %v3084_v27 = vmul.f32 %v2333_v57, %v2333_v57 }
 0x334   :  { %v3144_v1 = vadd.f32 %v3143_v39, %v3081_v55  ;;  %v3619_v19 = vpack.c.bf16 %v2325_v59, %v2322_v24  ;;  %v3011_v45 = vadd.f32 %v3010_v0, %v2325_v59  ;;  %v3082_v63 = vmul.f32 %v2325_v59, %v2325_v59 }
 0x335   :  { %3680 = vst [vmem:[#allocation9 + $0xc8] sm:$0xff] %v3624_v61  }
 0x336   :  { %3679 = vst [vmem:[#allocation9 + $0xc0] sm:$0xff] %v3619_v19   ;;  %v3012_v11 = vadd.f32 %v3011_v45, %v2330_v54  ;;  %v3145_v5 = vadd.f32 %v3144_v1, %v3082_v63 }
 0x338   :  { %v3146_v16 = vadd.f32 %v3145_v5, %v3083_v50  ;;  %v3013_v46 = vadd.f32 %v3012_v11, %v2333_v57 }
 0x33a   :  { %v3147_v32 = vadd.f32 %v3146_v16, %v3084_v27 }
 0x33e   :  { %v3797_v7 = vpop.f32.mrb[148].mxu1 }
 0x33f   :  { %v2337_v36 = vpop.f32.mrb[149].mxu1  ;;  %v2346_v12 = vadd.f32 %v3797_v7, %v4548_v29 }
 0x340   :  { %v2338_v22 = vadd.f32 %v4548_v29, %v2337_v36  ;;  %v3798_v9 = vpop.f32.mrb[150].mxu1 }
 0x341   :  { %v2349_v13 = vadd.f32 %v3798_v9, %v4548_v29  ;;  %v2340_v49 = vpop.f32.mrb[151].mxu1  ;;  %v3087_v3 = vmul.f32 %v2346_v12, %v2346_v12 }
 0x342   :  { %v3014_v43 = vadd.f32 %v3013_v46, %v2338_v22  ;;  %v3085_v15 = vmul.f32 %v2338_v22, %v2338_v22  ;;  %v2341_v28 = vadd.f32 %v4548_v29, %v2340_v49 }
 0x343   :  { %v3634_v17 = vpack.c.bf16 %v2349_v13, %v2346_v12  ;;  %v3088_v25 = vmul.f32 %v2349_v13, %v2349_v13 }
 0x344   :  { %v3148_v53 = vadd.f32 %v3147_v32, %v3085_v15  ;;  %v3629_v56 = vpack.c.bf16 %v2341_v28, %v2338_v22  ;;  %v3015_v18 = vadd.f32 %v3014_v43, %v2341_v28  ;;  %v3086_v21 = vmul.f32 %v2341_v28, %v2341_v28 }
 0x345   :  { %3682 = vst [vmem:[#allocation9 + $0xd8] sm:$0xff] %v3634_v17  }
 0x346   :  { %3681 = vst [vmem:[#allocation9 + $0xd0] sm:$0xff] %v3629_v56   ;;  %v3016_v60 = vadd.f32 %v3015_v18, %v2346_v12  ;;  %v3149_v38 = vadd.f32 %v3148_v53, %v3086_v21 }
 0x348   :  { %v3150_v6 = vadd.f32 %v3149_v38, %v3087_v3  ;;  %v3017_v4 = vadd.f32 %v3016_v60, %v2349_v13 }
 0x34a   :  { %v3151_v52 = vadd.f32 %v3150_v6, %v3088_v25 }
 0x34e   :  { %v3801_v20 = vpop.f32.mrb[152].mxu1 }
 0x34f   :  { %v2353_v58 = vpop.f32.mrb[153].mxu1  ;;  %v2362_v33 = vadd.f32 %v3801_v20, %v4548_v29 }
 0x350   :  { %v2354_v31 = vadd.f32 %v4548_v29, %v2353_v58  ;;  %v3802_v10 = vpop.f32.mrb[154].mxu1 }
 0x351   :  { %v2365_v34 = vadd.f32 %v3802_v10, %v4548_v29  ;;  %v2356_v35 = vpop.f32.mrb[155].mxu1  ;;  %v3091_v2 = vmul.f32 %v2362_v33, %v2362_v33 }
 0x352   :  { %v3018_v14 = vadd.f32 %v3017_v4, %v2354_v31  ;;  %v3089_v37 = vmul.f32 %v2354_v31, %v2354_v31  ;;  %v2357_v62 = vadd.f32 %v4548_v29, %v2356_v35 }
 0x353   :  { %v3644_v41 = vpack.c.bf16 %v2365_v34, %v2362_v33  ;;  %v3092_v39 = vmul.f32 %v2365_v34, %v2365_v34 }
 0x354   :  { %v3152_v23 = vadd.f32 %v3151_v52, %v3089_v37  ;;  %v3639_v42 = vpack.c.bf16 %v2357_v62, %v2354_v31  ;;  %v3019_v44 = vadd.f32 %v3018_v14, %v2357_v62  ;;  %v3090_v30 = vmul.f32 %v2357_v62, %v2357_v62 }
 0x355   :  { %3684 = vst [vmem:[#allocation9 + $0xe8] sm:$0xff] %v3644_v41  }
 0x356   :  { %3683 = vst [vmem:[#allocation9 + $0xe0] sm:$0xff] %v3639_v42   ;;  %v3020_v48 = vadd.f32 %v3019_v44, %v2362_v33  ;;  %v3153_v26 = vadd.f32 %v3152_v23, %v3090_v30 }
 0x358   :  { %v3154_v8 = vadd.f32 %v3153_v26, %v3091_v2  ;;  %v3021_v51 = vadd.f32 %v3020_v48, %v2365_v34 }
 0x35a   :  { %v3155_v24 = vadd.f32 %v3154_v8, %v3092_v39 }
 0x35e   :  { %v3805_v47 = vpop.f32.mrb[156].mxu1 }
 0x35f   :  { %v2369_v54 = vpop.f32.mrb[157].mxu1  ;;  %v2378_v0 = vadd.f32 %v3805_v47, %v4548_v29 }
 0x360   :  { %v2370_v57 = vadd.f32 %v4548_v29, %v2369_v54  ;;  %v3806_v40 = vpop.f32.mrb[158].mxu1 }
 0x361   :  { %v2381_v55 = vadd.f32 %v3806_v40, %v4548_v29  ;;  %v2372_v59 = vpop.f32.mrb[159].mxu1  ;;  %v3095_v27 = vmul.f32 %v2378_v0, %v2378_v0 }
 0x362   :  { %v3022_v61 = vadd.f32 %v3021_v51, %v2370_v57  ;;  %v3093_v1 = vmul.f32 %v2370_v57, %v2370_v57  ;;  %v2373_v19 = vadd.f32 %v4548_v29, %v2372_v59 }
 0x363   :  { %v3654_v45 = vpack.c.bf16 %v2381_v55, %v2378_v0 }
 0x364   :  { %v3156_v63 = vadd.f32 %v3155_v24, %v3093_v1  ;;  %v3649_v50 = vpack.c.bf16 %v2373_v19, %v2370_v57  ;;  %v3023_v11 = vadd.f32 %v3022_v61, %v2373_v19  ;;  %v3094_v5 = vmul.f32 %v2373_v19, %v2373_v19 }
 0x365   :  { %3686 = vst [vmem:[#allocation9 + $0xf8] sm:$0xff] %v3654_v45  }
 0x366   :  { %3685 = vst [vmem:[#allocation9 + $0xf0] sm:$0xff] %v3649_v50   ;;  %v3024_v16 = vadd.f32 %v3023_v11, %v2378_v0  ;;  %v3157_v46 = vadd.f32 %v3156_v63, %v3094_v5 }
 0x367   :  { %4238 = shalt.err (!%p4235_p0)
}
 0x368   :  { %s4239_s13 = scalar_lea.hbm %s4653_s4, 4096 }
 0x369   :  { %p4240_p1 = scmp.ne.s32.totalorder %s4653_s4, %s4239_s13  ;;  %p4243_p2 = scmp.lt.u32.totalorder %s4239_s13, %s4653_s4 }
 0x36b   :  { %p4245_p3 = pnand %p4243_p2, %p4240_p1 }
 0x36d   :  { %4248 = shalt.err (!%p4245_p3)
}
 0x36e   :  { %3178 = dma.vmem_to_hbm [thread:$0]  %s3173_s9, 4096, %s4653_s4, [#allocation5], %s4280_s28, %s4280_s28, %s4281_s29   ;;  %v3096_v29 = vmul.f32 %v2381_v55, %v2381_v55  ;;  %v3025_v32 = vadd.f32 %v3024_v16, %v2381_v55  ;;  %v3158_v7 = vadd.f32 %v3157_v46, %v3095_v27 }
 0x36f   :  { %s4288_s19 = smov [#allocation10]  }
 0x370   :  { %v3026_v36 = vrot.slane %v3025_v32, 4  ;;  %v3159_v22 = vadd.f32 %v3158_v7, %v3096_v29  ;;  %s3185_s20 = sshll.u32 %s4288_s19, 4  ;;  %s3186_s20 = int_to_ptr.vmem [resolvable:$true] %s3185_s20 }
 0x371   :  { %s4249_s4 = scalar_lea.vmem %s3186_s20, 32  ;;  %p4254_p5 = scmp.lt.s32.totalorder %s3186_s20, %s3186_s20 }
 0x372   :  { %v3027_v9 = vadd.f32 %v3026_v36, %v3025_v32  ;;  %v3160_v12 = vrot.slane %v3159_v22, 4  ;;  %p4250_p4 = scmp.ne.s32.totalorder %s3186_s20, %s4249_s4  ;;  %p4255_p6 = scmp.lt.s32.totalorder %s4249_s4, %s4249_s4 }
 0x374   :  { %v3028_v13 = vrot.slane %v3027_v9, 2  ;;  %v3161_v49 = vadd.f32 %v3160_v12, %v3159_v22  ;;  %p4256_p7 = por %p4255_p6, %p4254_p5 }
 0x376   :  { %v3029_v43 = vadd.f32 %v3028_v13, %v3027_v9  ;;  %v3162_v15 = vrot.slane %v3161_v49, 2  ;;  %p4257_p8 = pnand %p4256_p7, %p4250_p4 }
 0x378   :  { %v3030_v28 = vrot.slane %v3029_v43, 1  ;;  %v3163_v17 = vadd.f32 %v3162_v15, %v3161_v49 }
 0x37a   :  { %v3031_v53 = vadd.f32 %v3030_v28, %v3029_v43  ;;  %v3164_v56 = vrot.slane %v3163_v17, 1 }
 0x37c   :  { %3032 = vst [vmem:[#allocation10] sm:$0x1] %v3031_v53  ;;  %v3165_v18 = vadd.f32 %v3164_v56, %v3163_v17 }
 0x37e   :  { %3166 = vst [vmem:[#allocation10 + $0x1] sm:$0x1] %v3165_v18 }
 0x37f   :  { %4260 = shalt.err (!%p4257_p8)
}
 0x380   :  { %s4261_s21 = scalar_lea.hbm %s4654_s5, 32 }
 0x381   :  { %p4262_p9 = scmp.ne.s32.totalorder %s4654_s5, %s4261_s21  ;;  %p4265_p10 = scmp.lt.u32.totalorder %s4261_s21, %s4654_s5 }
 0x383   :  { %p4267_p11 = pnand %p4265_p10, %p4262_p9 }
 0x385   :  { %4270 = shalt.err (!%p4267_p11)
}
 0x386   :  { %3188 = dma.vmem_to_hbm [thread:$0]  %s3186_s20, 32, %s4654_s5, [#allocation11]  }
 0x387   :  { %4275 = dma.done.wait [#allocation5], 4096  }
 0x388   :  { %4276 = vsyncadd [#allocation5], 4294963200 }
 0x389   :  { %4277 = dma.done.wait [#allocation11], 32  }
 0x38a   :  { %4278 = vsyncadd [#allocation11], 4294967264 }
 0x38b   :  { %3195 = vsyncpa [#allocation4], 1 }
 0x38c   :  { %3196 = vsyncpa [#allocation7], 1 }
 0x38d   :  { %3197 = vsyncpa [#allocation5], 1 }
 0x38e   :  { %3198 = vsyncpa [#allocation11], 1 }

</bundles_post_ra>
